<compile_context>
chip_gen: v6e
topology: v6e:2x2x1
jax: 0.10.0
libtpu: 0.0.40
codegen_flags: <defaults>
</compile_context>

<pallas_src>
import functools
import math

import jax
import jax.numpy as jnp
from jax.experimental import pallas as pl
from jax.experimental.pallas import tpu as pltpu


# --------------------------------------------------------------------------
# Fused whole-model kernel
# --------------------------------------------------------------------------
def _unsup_bert_kernel(
    x_ref,                      # (B*S, H)  embeddings (word+pos+type), pre-LN
    emb_g_ref, emb_b_ref,       # (1, H)
    wqkv_ref, bqkv_ref,         # (L, H, 3H), (L, 1, 3H)
    wo_ref, bo_ref,             # (L, H, H), (L, 1, H)
    w1_ref, b1_ref,             # (L, H, I), (L, 1, I)
    w2_ref, b2_ref,             # (L, I, H), (L, 1, H)
    ln1_g_ref, ln1_b_ref,       # (L, 1, H)
    ln2_g_ref, ln2_b_ref,       # (L, 1, H)
    pool_w_ref, pool_b_ref,     # (H, H), (1, H)
    mask_ref,                   # (B, S) float {0,1}
    rand_ref,                   # (B, H) uniform [0,1) for dropout
    o_ref,                      # (B, H) output
    qkv_s,                      # VMEM scratch (B*S, 3H)
    ctx_s,                      # VMEM scratch (B*S, H)
    *, B, S, H, nh, dh, L, keep_prob, apply_dropout, eps,
):
    def ln(x, g, b):
        mean = jnp.mean(x, axis=-1, keepdims=True)
        var = jnp.mean(jnp.square(x - mean), axis=-1, keepdims=True)
        return (x - mean) * jax.lax.rsqrt(var + eps) * g + b

    def gelu(x):
        # tanh-approx GELU (gelu_new); erf-based GELU differs slightly.
        c = math.sqrt(2.0 / math.pi)
        return 0.5 * x * (1.0 + jnp.tanh(c * (x + 0.044715 * x * x * x)))

    scale = 1.0 / math.sqrt(dh)

    # ---- embedding layernorm ----
    x2 = ln(x_ref[...], emb_g_ref[...], emb_b_ref[...])          # (B*S, H)

    # additive attention mask, (B, S)
    neg = (1.0 - mask_ref[...]) * (-1e9)

    # ---- encoder layers (static unrolled loop; L is tiny) ----
    for l in range(L):
        # fused QKV projection: one (B*S, H) @ (H, 3H) matmul
        qkv_s[...] = (
            jnp.dot(x2, wqkv_ref[l], preferred_element_type=jnp.float32)
            + bqkv_ref[l]
        )

        # per-(batch, head) attention via static slicing of the VMEM scratch
        for b in range(B):
            m_b = neg[b:b + 1, :]                                  # (1, S)
            for h in range(nh):
                rows = slice(b * S, (b + 1) * S)
                q = qkv_s[rows, h * dh:(h + 1) * dh]               # (S, dh)
                k = qkv_s[rows, H + h * dh:H + (h + 1) * dh]       # (S, dh)
                v = qkv_s[rows, 2 * H + h * dh:2 * H + (h + 1) * dh]
                # scores = q @ k^T  (contract last dims, no explicit transpose)
                s = jax.lax.dot_general(
                    q, k, (((1,), (1,)), ((), ())),
                    preferred_element_type=jnp.float32) * scale + m_b
                s = s - jnp.max(s, axis=-1, keepdims=True)
                p = jnp.exp(s)
                p = p / jnp.sum(p, axis=-1, keepdims=True)
                ctx_s[rows, h * dh:(h + 1) * dh] = jnp.dot(
                    p, v, preferred_element_type=jnp.float32)

        attn_out = (
            jnp.dot(ctx_s[...], wo_ref[l], preferred_element_type=jnp.float32)
            + bo_ref[l]
        )
        x2 = ln(x2 + attn_out, ln1_g_ref[l], ln1_b_ref[l])

        # fused FFN: w1 + gelu + w2, intermediate stays in registers/VMEM
        hmid = gelu(
            jnp.dot(x2, w1_ref[l], preferred_element_type=jnp.float32)
            + b1_ref[l]
        )
        ffn = (
            jnp.dot(hmid, w2_ref[l], preferred_element_type=jnp.float32)
            + b2_ref[l]
        )
        x2 = ln(x2 + ffn, ln2_g_ref[l], ln2_b_ref[l])

    # ---- pooler: tanh(W @ hidden[:, 0, :] + b) ----
    cls = jnp.concatenate([x2[b * S:b * S + 1, :] for b in range(B)], axis=0)
    pooled = jnp.tanh(
        jnp.dot(cls, pool_w_ref[...], preferred_element_type=jnp.float32)
        + pool_b_ref[...]
    )

    # ---- module-level Dropout(0.3), fused ----
    if apply_dropout:
        keep = rand_ref[...] < keep_prob
        o_ref[...] = jnp.where(keep, pooled * (1.0 / keep_prob), 0.0)
    else:
        o_ref[...] = pooled


# --------------------------------------------------------------------------
# Tiny BERT: params + forward wrapper
# --------------------------------------------------------------------------
CFG = dict(vocab=100, hidden=32, heads=2, head_dim=16, inter=64,
           layers=2, max_pos=16, type_vocab=2)


def init_params(key, cfg):
    def nrm(k, shape):
        return jax.random.normal(k, shape, jnp.float32) * 0.02

    H, I = cfg["hidden"], cfg["inter"]
    keys = jax.random.split(key, 4 + cfg["layers"])
    params = {
        "word_emb": nrm(keys[0], (cfg["vocab"], H)),
        "pos_emb": nrm(keys[1], (cfg["max_pos"], H)),
        "type_emb": nrm(keys[2], (cfg["type_vocab"], H)),
        "emb_ln_g": jnp.ones((H,), jnp.float32),
        "emb_ln_b": jnp.zeros((H,), jnp.float32),
        "pool_w": nrm(keys[3], (H, H)),
        "pool_b": jnp.zeros((H,), jnp.float32),
        "layers": [],
    }
    for li in range(cfg["layers"]):
        lk = jax.random.split(keys[4 + li], 6)
        params["layers"].append({
            "wq": nrm(lk[0], (H, H)), "bq": jnp.zeros((H,), jnp.float32),
            "wk": nrm(lk[1], (H, H)), "bk": jnp.zeros((H,), jnp.float32),
            "wv": nrm(lk[2], (H, H)), "bv": jnp.zeros((H,), jnp.float32),
            "wo": nrm(lk[3], (H, H)), "bo": jnp.zeros((H,), jnp.float32),
            "w1": nrm(lk[4], (H, I)), "b1": jnp.zeros((I,), jnp.float32),
            "w2": nrm(lk[5], (I, H)), "b2": jnp.zeros((H,), jnp.float32),
            "ln1_g": jnp.ones((H,), jnp.float32), "ln1_b": jnp.zeros((H,), jnp.float32),
            "ln2_g": jnp.ones((H,), jnp.float32), "ln2_b": jnp.zeros((H,), jnp.float32),
        })
    return params


def unsup_bert_forward(params, input_ids, attention_mask, cfg,
                       dropout_key, is_unsup_train=True):
    B, S = input_ids.shape
    H, nh, dh = cfg["hidden"], cfg["heads"], cfg["head_dim"]
    I, L = cfg["inter"], cfg["layers"]

    # ---- embedding gathers (plain-JAX glue; gather has no tiny-Pallas win) ----
    x_emb = (params["word_emb"][input_ids]
             + params["pos_emb"][jnp.arange(S)][None, :, :]
             + params["type_emb"][0][None, None, :]).reshape(B * S, H)

    mask_f = attention_mask.astype(jnp.float32)                    # (B, S)
    rand = jax.random.uniform(dropout_key, (B, H), jnp.float32)    # dropout noise

    # ---- stack per-layer weights on a leading (L,) axis, QKV concatenated ----
    lps = params["layers"]
    wqkv = jnp.stack([jnp.concatenate([lp["wq"], lp["wk"], lp["wv"]], axis=1)
                      for lp in lps])                              # (L, H, 3H)
    bqkv = jnp.stack([jnp.concatenate([lp["bq"], lp["bk"], lp["bv"]])[None, :]
                      for lp in lps])                              # (L, 1, 3H)
    wo = jnp.stack([lp["wo"] for lp in lps])
    bo = jnp.stack([lp["bo"][None, :] for lp in lps])
    w1 = jnp.stack([lp["w1"] for lp in lps])
    b1 = jnp.stack([lp["b1"][None, :] for lp in lps])
    w2 = jnp.stack([lp["w2"] for lp in lps])
    b2 = jnp.stack([lp["b2"][None, :] for lp in lps])
    ln1_g = jnp.stack([lp["ln1_g"][None, :] for lp in lps])
    ln1_b = jnp.stack([lp["ln1_b"][None, :] for lp in lps])
    ln2_g = jnp.stack([lp["ln2_g"][None, :] for lp in lps])
    ln2_b = jnp.stack([lp["ln2_b"][None, :] for lp in lps])

    kernel = functools.partial(
        _unsup_bert_kernel,
        B=B, S=S, H=H, nh=nh, dh=dh, L=L,
        keep_prob=0.7, apply_dropout=bool(is_unsup_train), eps=1e-12,
    )

    return pl.pallas_call(
        kernel,
        out_shape=jax.ShapeDtypeStruct((B, H), jnp.float32),
        scratch_shapes=[
            pltpu.VMEM((B * S, 3 * H), jnp.float32),   # fused QKV result
            pltpu.VMEM((B * S, H), jnp.float32),       # attention context
        ],
    )(
        x_emb,
        params["emb_ln_g"].reshape(1, H), params["emb_ln_b"].reshape(1, H),
        wqkv, bqkv, wo, bo, w1, b1, w2, b2,
        ln1_g, ln1_b, ln2_g, ln2_b,
        params["pool_w"], params["pool_b"].reshape(1, H),
        mask_f, rand,
    )


# --------------------------------------------------------------------------
if __name__ == "__main__":
    cfg = CFG
    B, S = 2, 8

    root = jax.random.PRNGKey(0)
    k_param, k_ids, k_drop = jax.random.split(root, 3)
    params = init_params(k_param, cfg)

    input_ids = jax.random.randint(k_ids, (B, S), 0, cfg["vocab"], dtype=jnp.int32)
    attention_mask = jnp.array([[1, 1, 1, 1, 1, 1, 1, 1],
                                [1, 1, 1, 1, 1, 1, 0, 0]], dtype=jnp.int32)

    out = unsup_bert_forward(params, input_ids, attention_mask, cfg,
                             dropout_key=k_drop, is_unsup_train=True)
    out = jax.block_until_ready(out)
    assert out.shape == (B, cfg["hidden"]) and out.dtype == jnp.float32
    assert bool(jnp.all(jnp.isfinite(out)))
    print("KERNEL_OK")
</pallas_src>

<mosaic_0001>
module attributes {stable_mosaic.version = 11 : i64} {
  func.func @_unsup_bert_kernel(%arg0: memref<16x32xf32, #tpu.memory_space<vmem>>, %arg1: memref<1x32xf32, #tpu.memory_space<vmem>>, %arg2: memref<1x32xf32, #tpu.memory_space<vmem>>, %arg3: memref<2x32x96xf32, #tpu.memory_space<vmem>>, %arg4: memref<2x1x96xf32, #tpu.memory_space<vmem>>, %arg5: memref<2x32x32xf32, #tpu.memory_space<vmem>>, %arg6: memref<2x1x32xf32, #tpu.memory_space<vmem>>, %arg7: memref<2x32x64xf32, #tpu.memory_space<vmem>>, %arg8: memref<2x1x64xf32, #tpu.memory_space<vmem>>, %arg9: memref<2x64x32xf32, #tpu.memory_space<vmem>>, %arg10: memref<2x1x32xf32, #tpu.memory_space<vmem>>, %arg11: memref<2x1x32xf32, #tpu.memory_space<vmem>>, %arg12: memref<2x1x32xf32, #tpu.memory_space<vmem>>, %arg13: memref<2x1x32xf32, #tpu.memory_space<vmem>>, %arg14: memref<2x1x32xf32, #tpu.memory_space<vmem>>, %arg15: memref<32x32xf32, #tpu.memory_space<vmem>>, %arg16: memref<1x32xf32, #tpu.memory_space<vmem>>, %arg17: memref<2x8xf32, #tpu.memory_space<vmem>>, %arg18: memref<2x32xf32, #tpu.memory_space<vmem>>, %arg19: memref<2x32xf32, #tpu.memory_space<vmem>>, %arg20: memref<16x96xf32, #tpu.memory_space<vmem>>, %arg21: memref<16x32xf32, #tpu.memory_space<vmem>>) attributes {dimension_semantics = [], scalar_prefetch = 0 : i64, scratch_operands = 2 : i64, tpu.core_type = #tpu.core_type<tc>} {
    %c0 = arith.constant 0 : index
    %c0_0 = arith.constant 0 : index
    %0 = vector.load %arg0[%c0, %c0_0] : memref<16x32xf32, #tpu.memory_space<vmem>>, vector<16x32xf32>
    %c0_1 = arith.constant 0 : index
    %c0_2 = arith.constant 0 : index
    %1 = vector.load %arg1[%c0_1, %c0_2] : memref<1x32xf32, #tpu.memory_space<vmem>>, vector<1x32xf32>
    %c0_3 = arith.constant 0 : index
    %c0_4 = arith.constant 0 : index
    %2 = vector.load %arg2[%c0_3, %c0_4] : memref<1x32xf32, #tpu.memory_space<vmem>>, vector<1x32xf32>
    %cst = arith.constant dense<0.000000e+00> : vector<16xf32>
    %3 = vector.multi_reduction <add>, %0, %cst [1] : vector<16x32xf32> to vector<16xf32>
    %4 = vector.shape_cast %3 : vector<16xf32> to vector<16x1xf32>
    %cst_5 = arith.constant 3.200000e+01 : f32
    %5 = vector.broadcast %cst_5 : f32 to vector<16x1xf32>
    %6 = arith.divf %4, %5 : vector<16x1xf32>
    %7 = vector.broadcast %6 : vector<16x1xf32> to vector<16x32xf32>
    %8 = arith.subf %0, %7 : vector<16x32xf32>
    %9 = arith.mulf %8, %8 : vector<16x32xf32>
    %cst_6 = arith.constant dense<0.000000e+00> : vector<16xf32>
    %10 = vector.multi_reduction <add>, %9, %cst_6 [1] : vector<16x32xf32> to vector<16xf32>
    %11 = vector.shape_cast %10 : vector<16xf32> to vector<16x1xf32>
    %cst_7 = arith.constant 3.200000e+01 : f32
    %12 = vector.broadcast %cst_7 : f32 to vector<16x1xf32>
    %13 = arith.divf %11, %12 : vector<16x1xf32>
    %14 = vector.broadcast %6 : vector<16x1xf32> to vector<16x32xf32>
    %15 = arith.subf %0, %14 : vector<16x32xf32>
    %cst_8 = arith.constant 9.99999996E-13 : f32
    %16 = vector.broadcast %cst_8 : f32 to vector<16x1xf32>
    %17 = arith.addf %13, %16 : vector<16x1xf32>
    %18 = math.rsqrt %17 : vector<16x1xf32>
    %19 = vector.broadcast %18 : vector<16x1xf32> to vector<16x32xf32>
    %20 = arith.mulf %15, %19 : vector<16x32xf32>
    %21 = vector.broadcast %1 : vector<1x32xf32> to vector<16x32xf32>
    %22 = arith.mulf %20, %21 : vector<16x32xf32>
    %23 = vector.broadcast %2 : vector<1x32xf32> to vector<16x32xf32>
    %24 = arith.addf %22, %23 : vector<16x32xf32>
    %c0_9 = arith.constant 0 : index
    %c0_10 = arith.constant 0 : index
    %25 = vector.load %arg17[%c0_9, %c0_10] : memref<2x8xf32, #tpu.memory_space<vmem>>, vector<2x8xf32>
    %cst_11 = arith.constant 1.000000e+00 : f32
    %26 = vector.broadcast %cst_11 : f32 to vector<2x8xf32>
    %27 = arith.subf %26, %25 : vector<2x8xf32>
    %cst_12 = arith.constant -1.000000e+09 : f32
    %28 = vector.broadcast %cst_12 : f32 to vector<2x8xf32>
    %29 = arith.mulf %27, %28 : vector<2x8xf32>
    %c0_13 = arith.constant 0 : index
    %c0_14 = arith.constant 0 : index
    %c0_15 = arith.constant 0 : index
    %30 = vector.load %arg3[%c0_13, %c0_14, %c0_15] : memref<2x32x96xf32, #tpu.memory_space<vmem>>, vector<1x32x96xf32>
    %31 = vector.shape_cast %30 : vector<1x32x96xf32> to vector<32x96xf32>
    %cst_16 = arith.constant dense<0.000000e+00> : vector<16x96xf32>
    %32 = tpu.matmul %24, %31, %cst_16 {dimension_numbers = #tpu.dot_dimension_numbers<[1], [0], [0], [1], [0, 0, 1, 1], [], []>} : vector<16x32xf32>, vector<32x96xf32>, vector<16x96xf32> -> vector<16x96xf32>
    %c0_17 = arith.constant 0 : index
    %c0_18 = arith.constant 0 : index
    %c0_19 = arith.constant 0 : index
    %33 = vector.load %arg4[%c0_17, %c0_18, %c0_19] : memref<2x1x96xf32, #tpu.memory_space<vmem>>, vector<1x1x96xf32>
    %34 = vector.shape_cast %33 : vector<1x1x96xf32> to vector<1x96xf32>
    %35 = vector.broadcast %34 : vector<1x96xf32> to vector<16x96xf32>
    %36 = arith.addf %32, %35 : vector<16x96xf32>
    %c0_20 = arith.constant 0 : index
    %c0_21 = arith.constant 0 : index
    %37 = vector.load %arg20[%c0_20, %c0_21] : memref<16x96xf32, #tpu.memory_space<vmem>>, vector<16x96xf32>
    tpu.vector_store %arg20[%c0_20, %c0_21], %36 {strides = array<i32>} : memref<16x96xf32, #tpu.memory_space<vmem>>, vector<16x96xf32>,
    %38 = vector.extract_strided_slice %29 {offsets = [0, 0], sizes = [1, 8], strides = [1, 1]} : vector<2x8xf32> to vector<1x8xf32>
    %c0_22 = arith.constant 0 : index
    %c0_23 = arith.constant 0 : index
    %39 = vector.load %arg20[%c0_22, %c0_23] : memref<16x96xf32, #tpu.memory_space<vmem>>, vector<8x16xf32>
    %c0_24 = arith.constant 0 : index
    %c32 = arith.constant 32 : index
    %40 = vector.load %arg20[%c0_24, %c32] : memref<16x96xf32, #tpu.memory_space<vmem>>, vector<8x16xf32>
    %c0_25 = arith.constant 0 : index
    %c64 = arith.constant 64 : index
    %41 = vector.load %arg20[%c0_25, %c64] : memref<16x96xf32, #tpu.memory_space<vmem>>, vector<8x16xf32>
    %cst_26 = arith.constant dense<0.000000e+00> : vector<8x8xf32>
    %42 = tpu.matmul %39, %40, %cst_26 {dimension_numbers = #tpu.dot_dimension_numbers<[1], [1], [0], [0], [0, 0, 1, 0], [], []>} : vector<8x16xf32>, vector<8x16xf32>, vector<8x8xf32> -> vector<8x8xf32>
    %cst_27 = arith.constant 2.500000e-01 : f32
    %43 = vector.broadcast %cst_27 : f32 to vector<8x8xf32>
    %44 = arith.mulf %42, %43 : vector<8x8xf32>
    %45 = vector.broadcast %38 : vector<1x8xf32> to vector<8x8xf32>
    %46 = arith.addf %44, %45 : vector<8x8xf32>
    %cst_28 = arith.constant dense<0xFF800000> : vector<8xf32>
    %47 = vector.multi_reduction <maximumf>, %46, %cst_28 [1] : vector<8x8xf32> to vector<8xf32>
    %48 = vector.shape_cast %47 : vector<8xf32> to vector<8x1xf32>
    %49 = vector.broadcast %48 : vector<8x1xf32> to vector<8x8xf32>
    %50 = arith.subf %46, %49 : vector<8x8xf32>
    %51 = math.exp %50 : vector<8x8xf32>
    %cst_29 = arith.constant dense<0.000000e+00> : vector<8xf32>
    %52 = vector.multi_reduction <add>, %51, %cst_29 [1] : vector<8x8xf32> to vector<8xf32>
    %53 = vector.shape_cast %52 : vector<8xf32> to vector<8x1xf32>
    %54 = vector.broadcast %53 : vector<8x1xf32> to vector<8x8xf32>
    %55 = arith.divf %51, %54 : vector<8x8xf32>
    %cst_30 = arith.constant dense<0.000000e+00> : vector<8x16xf32>
    %56 = tpu.matmul %55, %41, %cst_30 {dimension_numbers = #tpu.dot_dimension_numbers<[1], [0], [0], [1], [0, 0, 1, 1], [], []>} : vector<8x8xf32>, vector<8x16xf32>, vector<8x16xf32> -> vector<8x16xf32>
    %c0_31 = arith.constant 0 : index
    %c0_32 = arith.constant 0 : index
    %57 = vector.load %arg21[%c0_31, %c0_32] : memref<16x32xf32, #tpu.memory_space<vmem>>, vector<8x16xf32>
    tpu.vector_store %arg21[%c0_31, %c0_32], %56 {strides = array<i32>} : memref<16x32xf32, #tpu.memory_space<vmem>>, vector<8x16xf32>,
    %c0_33 = arith.constant 0 : index
    %c16 = arith.constant 16 : index
    %58 = vector.load %arg20[%c0_33, %c16] : memref<16x96xf32, #tpu.memory_space<vmem>>, vector<8x16xf32>
    %c0_34 = arith.constant 0 : index
    %c48 = arith.constant 48 : index
    %59 = vector.load %arg20[%c0_34, %c48] : memref<16x96xf32, #tpu.memory_space<vmem>>, vector<8x16xf32>
    %c0_35 = arith.constant 0 : index
    %c80 = arith.constant 80 : index
    %60 = vector.load %arg20[%c0_35, %c80] : memref<16x96xf32, #tpu.memory_space<vmem>>, vector<8x16xf32>
    %cst_36 = arith.constant dense<0.000000e+00> : vector<8x8xf32>
    %61 = tpu.matmul %58, %59, %cst_36 {dimension_numbers = #tpu.dot_dimension_numbers<[1], [1], [0], [0], [0, 0, 1, 0], [], []>} : vector<8x16xf32>, vector<8x16xf32>, vector<8x8xf32> -> vector<8x8xf32>
    %cst_37 = arith.constant 2.500000e-01 : f32
    %62 = vector.broadcast %cst_37 : f32 to vector<8x8xf32>
    %63 = arith.mulf %61, %62 : vector<8x8xf32>
    %64 = vector.broadcast %38 : vector<1x8xf32> to vector<8x8xf32>
    %65 = arith.addf %63, %64 : vector<8x8xf32>
    %cst_38 = arith.constant dense<0xFF800000> : vector<8xf32>
    %66 = vector.multi_reduction <maximumf>, %65, %cst_38 [1] : vector<8x8xf32> to vector<8xf32>
    %67 = vector.shape_cast %66 : vector<8xf32> to vector<8x1xf32>
    %68 = vector.broadcast %67 : vector<8x1xf32> to vector<8x8xf32>
    %69 = arith.subf %65, %68 : vector<8x8xf32>
    %70 = math.exp %69 : vector<8x8xf32>
    %cst_39 = arith.constant dense<0.000000e+00> : vector<8xf32>
    %71 = vector.multi_reduction <add>, %70, %cst_39 [1] : vector<8x8xf32> to vector<8xf32>
    %72 = vector.shape_cast %71 : vector<8xf32> to vector<8x1xf32>
    %73 = vector.broadcast %72 : vector<8x1xf32> to vector<8x8xf32>
    %74 = arith.divf %70, %73 : vector<8x8xf32>
    %cst_40 = arith.constant dense<0.000000e+00> : vector<8x16xf32>
    %75 = tpu.matmul %74, %60, %cst_40 {dimension_numbers = #tpu.dot_dimension_numbers<[1], [0], [0], [1], [0, 0, 1, 1], [], []>} : vector<8x8xf32>, vector<8x16xf32>, vector<8x16xf32> -> vector<8x16xf32>
    %c0_41 = arith.constant 0 : index
    %c16_42 = arith.constant 16 : index
    %76 = vector.load %arg21[%c0_41, %c16_42] : memref<16x32xf32, #tpu.memory_space<vmem>>, vector<8x16xf32>
    tpu.vector_store %arg21[%c0_41, %c16_42], %75 {strides = array<i32>} : memref<16x32xf32, #tpu.memory_space<vmem>>, vector<8x16xf32>,
    %77 = vector.extract_strided_slice %29 {offsets = [1, 0], sizes = [1, 8], strides = [1, 1]} : vector<2x8xf32> to vector<1x8xf32>
    %c8 = arith.constant 8 : index
    %c0_43 = arith.constant 0 : index
    %78 = vector.load %arg20[%c8, %c0_43] : memref<16x96xf32, #tpu.memory_space<vmem>>, vector<8x16xf32>
    %c8_44 = arith.constant 8 : index
    %c32_45 = arith.constant 32 : index
    %79 = vector.load %arg20[%c8_44, %c32_45] : memref<16x96xf32, #tpu.memory_space<vmem>>, vector<8x16xf32>
    %c8_46 = arith.constant 8 : index
    %c64_47 = arith.constant 64 : index
    %80 = vector.load %arg20[%c8_46, %c64_47] : memref<16x96xf32, #tpu.memory_space<vmem>>, vector<8x16xf32>
    %cst_48 = arith.constant dense<0.000000e+00> : vector<8x8xf32>
    %81 = tpu.matmul %78, %79, %cst_48 {dimension_numbers = #tpu.dot_dimension_numbers<[1], [1], [0], [0], [0, 0, 1, 0], [], []>} : vector<8x16xf32>, vector<8x16xf32>, vector<8x8xf32> -> vector<8x8xf32>
    %cst_49 = arith.constant 2.500000e-01 : f32
    %82 = vector.broadcast %cst_49 : f32 to vector<8x8xf32>
    %83 = arith.mulf %81, %82 : vector<8x8xf32>
    %84 = vector.broadcast %77 : vector<1x8xf32> to vector<8x8xf32>
    %85 = arith.addf %83, %84 : vector<8x8xf32>
    %cst_50 = arith.constant dense<0xFF800000> : vector<8xf32>
    %86 = vector.multi_reduction <maximumf>, %85, %cst_50 [1] : vector<8x8xf32> to vector<8xf32>
    %87 = vector.shape_cast %86 : vector<8xf32> to vector<8x1xf32>
    %88 = vector.broadcast %87 : vector<8x1xf32> to vector<8x8xf32>
    %89 = arith.subf %85, %88 : vector<8x8xf32>
    %90 = math.exp %89 : vector<8x8xf32>
    %cst_51 = arith.constant dense<0.000000e+00> : vector<8xf32>
    %91 = vector.multi_reduction <add>, %90, %cst_51 [1] : vector<8x8xf32> to vector<8xf32>
    %92 = vector.shape_cast %91 : vector<8xf32> to vector<8x1xf32>
    %93 = vector.broadcast %92 : vector<8x1xf32> to vector<8x8xf32>
    %94 = arith.divf %90, %93 : vector<8x8xf32>
    %cst_52 = arith.constant dense<0.000000e+00> : vector<8x16xf32>
    %95 = tpu.matmul %94, %80, %cst_52 {dimension_numbers = #tpu.dot_dimension_numbers<[1], [0], [0], [1], [0, 0, 1, 1], [], []>} : vector<8x8xf32>, vector<8x16xf32>, vector<8x16xf32> -> vector<8x16xf32>
    %c8_53 = arith.constant 8 : index
    %c0_54 = arith.constant 0 : index
    %96 = vector.load %arg21[%c8_53, %c0_54] : memref<16x32xf32, #tpu.memory_space<vmem>>, vector<8x16xf32>
    tpu.vector_store %arg21[%c8_53, %c0_54], %95 {strides = array<i32>} : memref<16x32xf32, #tpu.memory_space<vmem>>, vector<8x16xf32>,
    %c8_55 = arith.constant 8 : index
    %c16_56 = arith.constant 16 : index
    %97 = vector.load %arg20[%c8_55, %c16_56] : memref<16x96xf32, #tpu.memory_space<vmem>>, vector<8x16xf32>
    %c8_57 = arith.constant 8 : index
    %c48_58 = arith.constant 48 : index
    %98 = vector.load %arg20[%c8_57, %c48_58] : memref<16x96xf32, #tpu.memory_space<vmem>>, vector<8x16xf32>
    %c8_59 = arith.constant 8 : index
    %c80_60 = arith.constant 80 : index
    %99 = vector.load %arg20[%c8_59, %c80_60] : memref<16x96xf32, #tpu.memory_space<vmem>>, vector<8x16xf32>
    %cst_61 = arith.constant dense<0.000000e+00> : vector<8x8xf32>
    %100 = tpu.matmul %97, %98, %cst_61 {dimension_numbers = #tpu.dot_dimension_numbers<[1], [1], [0], [0], [0, 0, 1, 0], [], []>} : vector<8x16xf32>, vector<8x16xf32>, vector<8x8xf32> -> vector<8x8xf32>
    %cst_62 = arith.constant 2.500000e-01 : f32
    %101 = vector.broadcast %cst_62 : f32 to vector<8x8xf32>
    %102 = arith.mulf %100, %101 : vector<8x8xf32>
    %103 = vector.broadcast %77 : vector<1x8xf32> to vector<8x8xf32>
    %104 = arith.addf %102, %103 : vector<8x8xf32>
    %cst_63 = arith.constant dense<0xFF800000> : vector<8xf32>
    %105 = vector.multi_reduction <maximumf>, %104, %cst_63 [1] : vector<8x8xf32> to vector<8xf32>
    %106 = vector.shape_cast %105 : vector<8xf32> to vector<8x1xf32>
    %107 = vector.broadcast %106 : vector<8x1xf32> to vector<8x8xf32>
    %108 = arith.subf %104, %107 : vector<8x8xf32>
    %109 = math.exp %108 : vector<8x8xf32>
    %cst_64 = arith.constant dense<0.000000e+00> : vector<8xf32>
    %110 = vector.multi_reduction <add>, %109, %cst_64 [1] : vector<8x8xf32> to vector<8xf32>
    %111 = vector.shape_cast %110 : vector<8xf32> to vector<8x1xf32>
    %112 = vector.broadcast %111 : vector<8x1xf32> to vector<8x8xf32>
    %113 = arith.divf %109, %112 : vector<8x8xf32>
    %cst_65 = arith.constant dense<0.000000e+00> : vector<8x16xf32>
    %114 = tpu.matmul %113, %99, %cst_65 {dimension_numbers = #tpu.dot_dimension_numbers<[1], [0], [0], [1], [0, 0, 1, 1], [], []>} : vector<8x8xf32>, vector<8x16xf32>, vector<8x16xf32> -> vector<8x16xf32>
    %c8_66 = arith.constant 8 : index
    %c16_67 = arith.constant 16 : index
    %115 = vector.load %arg21[%c8_66, %c16_67] : memref<16x32xf32, #tpu.memory_space<vmem>>, vector<8x16xf32>
    tpu.vector_store %arg21[%c8_66, %c16_67], %114 {strides = array<i32>} : memref<16x32xf32, #tpu.memory_space<vmem>>, vector<8x16xf32>,
    %c0_68 = arith.constant 0 : index
    %c0_69 = arith.constant 0 : index
    %116 = vector.load %arg21[%c0_68, %c0_69] : memref<16x32xf32, #tpu.memory_space<vmem>>, vector<16x32xf32>
    %c0_70 = arith.constant 0 : index
    %c0_71 = arith.constant 0 : index
    %c0_72 = arith.constant 0 : index
    %117 = vector.load %arg5[%c0_70, %c0_71, %c0_72] : memref<2x32x32xf32, #tpu.memory_space<vmem>>, vector<1x32x32xf32>
    %118 = vector.shape_cast %117 : vector<1x32x32xf32> to vector<32x32xf32>
    %cst_73 = arith.constant dense<0.000000e+00> : vector<16x32xf32>
    %119 = tpu.matmul %116, %118, %cst_73 {dimension_numbers = #tpu.dot_dimension_numbers<[1], [0], [0], [1], [0, 0, 1, 1], [], []>} : vector<16x32xf32>, vector<32x32xf32>, vector<16x32xf32> -> vector<16x32xf32>
    %c0_74 = arith.constant 0 : index
    %c0_75 = arith.constant 0 : index
    %c0_76 = arith.constant 0 : index
    %120 = vector.load %arg6[%c0_74, %c0_75, %c0_76] : memref<2x1x32xf32, #tpu.memory_space<vmem>>, vector<1x1x32xf32>
    %121 = vector.shape_cast %120 : vector<1x1x32xf32> to vector<1x32xf32>
    %122 = vector.broadcast %121 : vector<1x32xf32> to vector<16x32xf32>
    %123 = arith.addf %119, %122 : vector<16x32xf32>
    %124 = arith.addf %24, %123 : vector<16x32xf32>
    %c0_77 = arith.constant 0 : index
    %c0_78 = arith.constant 0 : index
    %c0_79 = arith.constant 0 : index
    %125 = vector.load %arg11[%c0_77, %c0_78, %c0_79] : memref<2x1x32xf32, #tpu.memory_space<vmem>>, vector<1x1x32xf32>
    %126 = vector.shape_cast %125 : vector<1x1x32xf32> to vector<1x32xf32>
    %c0_80 = arith.constant 0 : index
    %c0_81 = arith.constant 0 : index
    %c0_82 = arith.constant 0 : index
    %127 = vector.load %arg12[%c0_80, %c0_81, %c0_82] : memref<2x1x32xf32, #tpu.memory_space<vmem>>, vector<1x1x32xf32>
    %128 = vector.shape_cast %127 : vector<1x1x32xf32> to vector<1x32xf32>
    %cst_83 = arith.constant dense<0.000000e+00> : vector<16xf32>
    %129 = vector.multi_reduction <add>, %124, %cst_83 [1] : vector<16x32xf32> to vector<16xf32>
    %130 = vector.shape_cast %129 : vector<16xf32> to vector<16x1xf32>
    %cst_84 = arith.constant 3.200000e+01 : f32
    %131 = vector.broadcast %cst_84 : f32 to vector<16x1xf32>
    %132 = arith.divf %130, %131 : vector<16x1xf32>
    %133 = vector.broadcast %132 : vector<16x1xf32> to vector<16x32xf32>
    %134 = arith.subf %124, %133 : vector<16x32xf32>
    %135 = arith.mulf %134, %134 : vector<16x32xf32>
    %cst_85 = arith.constant dense<0.000000e+00> : vector<16xf32>
    %136 = vector.multi_reduction <add>, %135, %cst_85 [1] : vector<16x32xf32> to vector<16xf32>
    %137 = vector.shape_cast %136 : vector<16xf32> to vector<16x1xf32>
    %cst_86 = arith.constant 3.200000e+01 : f32
    %138 = vector.broadcast %cst_86 : f32 to vector<16x1xf32>
    %139 = arith.divf %137, %138 : vector<16x1xf32>
    %140 = vector.broadcast %132 : vector<16x1xf32> to vector<16x32xf32>
    %141 = arith.subf %124, %140 : vector<16x32xf32>
    %cst_87 = arith.constant 9.99999996E-13 : f32
    %142 = vector.broadcast %cst_87 : f32 to vector<16x1xf32>
    %143 = arith.addf %139, %142 : vector<16x1xf32>
    %144 = math.rsqrt %143 : vector<16x1xf32>
    %145 = vector.broadcast %144 : vector<16x1xf32> to vector<16x32xf32>
    %146 = arith.mulf %141, %145 : vector<16x32xf32>
    %147 = vector.broadcast %126 : vector<1x32xf32> to vector<16x32xf32>
    %148 = arith.mulf %146, %147 : vector<16x32xf32>
    %149 = vector.broadcast %128 : vector<1x32xf32> to vector<16x32xf32>
    %150 = arith.addf %148, %149 : vector<16x32xf32>
    %c0_88 = arith.constant 0 : index
    %c0_89 = arith.constant 0 : index
    %c0_90 = arith.constant 0 : index
    %151 = vector.load %arg7[%c0_88, %c0_89, %c0_90] : memref<2x32x64xf32, #tpu.memory_space<vmem>>, vector<1x32x64xf32>
    %152 = vector.shape_cast %151 : vector<1x32x64xf32> to vector<32x64xf32>
    %cst_91 = arith.constant dense<0.000000e+00> : vector<16x64xf32>
    %153 = tpu.matmul %150, %152, %cst_91 {dimension_numbers = #tpu.dot_dimension_numbers<[1], [0], [0], [1], [0, 0, 1, 1], [], []>} : vector<16x32xf32>, vector<32x64xf32>, vector<16x64xf32> -> vector<16x64xf32>
    %c0_92 = arith.constant 0 : index
    %c0_93 = arith.constant 0 : index
    %c0_94 = arith.constant 0 : index
    %154 = vector.load %arg8[%c0_92, %c0_93, %c0_94] : memref<2x1x64xf32, #tpu.memory_space<vmem>>, vector<1x1x64xf32>
    %155 = vector.shape_cast %154 : vector<1x1x64xf32> to vector<1x64xf32>
    %156 = vector.broadcast %155 : vector<1x64xf32> to vector<16x64xf32>
    %157 = arith.addf %153, %156 : vector<16x64xf32>
    %cst_95 = arith.constant 5.000000e-01 : f32
    %158 = vector.broadcast %cst_95 : f32 to vector<16x64xf32>
    %159 = arith.mulf %158, %157 : vector<16x64xf32>
    %cst_96 = arith.constant 4.471500e-02 : f32
    %160 = vector.broadcast %cst_96 : f32 to vector<16x64xf32>
    %161 = arith.mulf %160, %157 : vector<16x64xf32>
    %162 = arith.mulf %161, %157 : vector<16x64xf32>
    %163 = arith.mulf %162, %157 : vector<16x64xf32>
    %164 = arith.addf %157, %163 : vector<16x64xf32>
    %cst_97 = arith.constant 0.797884583 : f32
    %165 = vector.broadcast %cst_97 : f32 to vector<16x64xf32>
    %166 = arith.mulf %165, %164 : vector<16x64xf32>
    %167 = math.tanh %166 : vector<16x64xf32>
    %cst_98 = arith.constant 1.000000e+00 : f32
    %168 = vector.broadcast %cst_98 : f32 to vector<16x64xf32>
    %169 = arith.addf %168, %167 : vector<16x64xf32>
    %170 = arith.mulf %159, %169 : vector<16x64xf32>
    %c0_99 = arith.constant 0 : index
    %c0_100 = arith.constant 0 : index
    %c0_101 = arith.constant 0 : index
    %171 = vector.load %arg9[%c0_99, %c0_100, %c0_101] : memref<2x64x32xf32, #tpu.memory_space<vmem>>, vector<1x64x32xf32>
    %172 = vector.shape_cast %171 : vector<1x64x32xf32> to vector<64x32xf32>
    %cst_102 = arith.constant dense<0.000000e+00> : vector<16x32xf32>
    %173 = tpu.matmul %170, %172, %cst_102 {dimension_numbers = #tpu.dot_dimension_numbers<[1], [0], [0], [1], [0, 0, 1, 1], [], []>} : vector<16x64xf32>, vector<64x32xf32>, vector<16x32xf32> -> vector<16x32xf32>
    %c0_103 = arith.constant 0 : index
    %c0_104 = arith.constant 0 : index
    %c0_105 = arith.constant 0 : index
    %174 = vector.load %arg10[%c0_103, %c0_104, %c0_105] : memref<2x1x32xf32, #tpu.memory_space<vmem>>, vector<1x1x32xf32>
    %175 = vector.shape_cast %174 : vector<1x1x32xf32> to vector<1x32xf32>
    %176 = vector.broadcast %175 : vector<1x32xf32> to vector<16x32xf32>
    %177 = arith.addf %173, %176 : vector<16x32xf32>
    %178 = arith.addf %150, %177 : vector<16x32xf32>
    %c0_106 = arith.constant 0 : index
    %c0_107 = arith.constant 0 : index
    %c0_108 = arith.constant 0 : index
    %179 = vector.load %arg13[%c0_106, %c0_107, %c0_108] : memref<2x1x32xf32, #tpu.memory_space<vmem>>, vector<1x1x32xf32>
    %180 = vector.shape_cast %179 : vector<1x1x32xf32> to vector<1x32xf32>
    %c0_109 = arith.constant 0 : index
    %c0_110 = arith.constant 0 : index
    %c0_111 = arith.constant 0 : index
    %181 = vector.load %arg14[%c0_109, %c0_110, %c0_111] : memref<2x1x32xf32, #tpu.memory_space<vmem>>, vector<1x1x32xf32>
    %182 = vector.shape_cast %181 : vector<1x1x32xf32> to vector<1x32xf32>
    %cst_112 = arith.constant dense<0.000000e+00> : vector<16xf32>
    %183 = vector.multi_reduction <add>, %178, %cst_112 [1] : vector<16x32xf32> to vector<16xf32>
    %184 = vector.shape_cast %183 : vector<16xf32> to vector<16x1xf32>
    %cst_113 = arith.constant 3.200000e+01 : f32
    %185 = vector.broadcast %cst_113 : f32 to vector<16x1xf32>
    %186 = arith.divf %184, %185 : vector<16x1xf32>
    %187 = vector.broadcast %186 : vector<16x1xf32> to vector<16x32xf32>
    %188 = arith.subf %178, %187 : vector<16x32xf32>
    %189 = arith.mulf %188, %188 : vector<16x32xf32>
    %cst_114 = arith.constant dense<0.000000e+00> : vector<16xf32>
    %190 = vector.multi_reduction <add>, %189, %cst_114 [1] : vector<16x32xf32> to vector<16xf32>
    %191 = vector.shape_cast %190 : vector<16xf32> to vector<16x1xf32>
    %cst_115 = arith.constant 3.200000e+01 : f32
    %192 = vector.broadcast %cst_115 : f32 to vector<16x1xf32>
    %193 = arith.divf %191, %192 : vector<16x1xf32>
    %194 = vector.broadcast %186 : vector<16x1xf32> to vector<16x32xf32>
    %195 = arith.subf %178, %194 : vector<16x32xf32>
    %cst_116 = arith.constant 9.99999996E-13 : f32
    %196 = vector.broadcast %cst_116 : f32 to vector<16x1xf32>
    %197 = arith.addf %193, %196 : vector<16x1xf32>
    %198 = math.rsqrt %197 : vector<16x1xf32>
    %199 = vector.broadcast %198 : vector<16x1xf32> to vector<16x32xf32>
    %200 = arith.mulf %195, %199 : vector<16x32xf32>
    %201 = vector.broadcast %180 : vector<1x32xf32> to vector<16x32xf32>
    %202 = arith.mulf %200, %201 : vector<16x32xf32>
    %203 = vector.broadcast %182 : vector<1x32xf32> to vector<16x32xf32>
    %204 = arith.addf %202, %203 : vector<16x32xf32>
    %c1 = arith.constant 1 : index
    %c0_117 = arith.constant 0 : index
    %c0_118 = arith.constant 0 : index
    %205 = vector.load %arg3[%c1, %c0_117, %c0_118] : memref<2x32x96xf32, #tpu.memory_space<vmem>>, vector<1x32x96xf32>
    %206 = vector.shape_cast %205 : vector<1x32x96xf32> to vector<32x96xf32>
    %cst_119 = arith.constant dense<0.000000e+00> : vector<16x96xf32>
    %207 = tpu.matmul %204, %206, %cst_119 {dimension_numbers = #tpu.dot_dimension_numbers<[1], [0], [0], [1], [0, 0, 1, 1], [], []>} : vector<16x32xf32>, vector<32x96xf32>, vector<16x96xf32> -> vector<16x96xf32>
    %c1_120 = arith.constant 1 : index
    %c0_121 = arith.constant 0 : index
    %c0_122 = arith.constant 0 : index
    %208 = vector.load %arg4[%c1_120, %c0_121, %c0_122] : memref<2x1x96xf32, #tpu.memory_space<vmem>>, vector<1x1x96xf32>
    %209 = vector.shape_cast %208 : vector<1x1x96xf32> to vector<1x96xf32>
    %210 = vector.broadcast %209 : vector<1x96xf32> to vector<16x96xf32>
    %211 = arith.addf %207, %210 : vector<16x96xf32>
    %c0_123 = arith.constant 0 : index
    %c0_124 = arith.constant 0 : index
    %212 = vector.load %arg20[%c0_123, %c0_124] : memref<16x96xf32, #tpu.memory_space<vmem>>, vector<16x96xf32>
    tpu.vector_store %arg20[%c0_123, %c0_124], %211 {strides = array<i32>} : memref<16x96xf32, #tpu.memory_space<vmem>>, vector<16x96xf32>,
    %213 = vector.extract_strided_slice %29 {offsets = [0, 0], sizes = [1, 8], strides = [1, 1]} : vector<2x8xf32> to vector<1x8xf32>
    %c0_125 = arith.constant 0 : index
    %c0_126 = arith.constant 0 : index
    %214 = vector.load %arg20[%c0_125, %c0_126] : memref<16x96xf32, #tpu.memory_space<vmem>>, vector<8x16xf32>
    %c0_127 = arith.constant 0 : index
    %c32_128 = arith.constant 32 : index
    %215 = vector.load %arg20[%c0_127, %c32_128] : memref<16x96xf32, #tpu.memory_space<vmem>>, vector<8x16xf32>
    %c0_129 = arith.constant 0 : index
    %c64_130 = arith.constant 64 : index
    %216 = vector.load %arg20[%c0_129, %c64_130] : memref<16x96xf32, #tpu.memory_space<vmem>>, vector<8x16xf32>
    %cst_131 = arith.constant dense<0.000000e+00> : vector<8x8xf32>
    %217 = tpu.matmul %214, %215, %cst_131 {dimension_numbers = #tpu.dot_dimension_numbers<[1], [1], [0], [0], [0, 0, 1, 0], [], []>} : vector<8x16xf32>, vector<8x16xf32>, vector<8x8xf32> -> vector<8x8xf32>
    %cst_132 = arith.constant 2.500000e-01 : f32
    %218 = vector.broadcast %cst_132 : f32 to vector<8x8xf32>
    %219 = arith.mulf %217, %218 : vector<8x8xf32>
    %220 = vector.broadcast %213 : vector<1x8xf32> to vector<8x8xf32>
    %221 = arith.addf %219, %220 : vector<8x8xf32>
    %cst_133 = arith.constant dense<0xFF800000> : vector<8xf32>
    %222 = vector.multi_reduction <maximumf>, %221, %cst_133 [1] : vector<8x8xf32> to vector<8xf32>
    %223 = vector.shape_cast %222 : vector<8xf32> to vector<8x1xf32>
    %224 = vector.broadcast %223 : vector<8x1xf32> to vector<8x8xf32>
    %225 = arith.subf %221, %224 : vector<8x8xf32>
    %226 = math.exp %225 : vector<8x8xf32>
    %cst_134 = arith.constant dense<0.000000e+00> : vector<8xf32>
    %227 = vector.multi_reduction <add>, %226, %cst_134 [1] : vector<8x8xf32> to vector<8xf32>
    %228 = vector.shape_cast %227 : vector<8xf32> to vector<8x1xf32>
    %229 = vector.broadcast %228 : vector<8x1xf32> to vector<8x8xf32>
    %230 = arith.divf %226, %229 : vector<8x8xf32>
    %cst_135 = arith.constant dense<0.000000e+00> : vector<8x16xf32>
    %231 = tpu.matmul %230, %216, %cst_135 {dimension_numbers = #tpu.dot_dimension_numbers<[1], [0], [0], [1], [0, 0, 1, 1], [], []>} : vector<8x8xf32>, vector<8x16xf32>, vector<8x16xf32> -> vector<8x16xf32>
    %c0_136 = arith.constant 0 : index
    %c0_137 = arith.constant 0 : index
    %232 = vector.load %arg21[%c0_136, %c0_137] : memref<16x32xf32, #tpu.memory_space<vmem>>, vector<8x16xf32>
    tpu.vector_store %arg21[%c0_136, %c0_137], %231 {strides = array<i32>} : memref<16x32xf32, #tpu.memory_space<vmem>>, vector<8x16xf32>,
    %c0_138 = arith.constant 0 : index
    %c16_139 = arith.constant 16 : index
    %233 = vector.load %arg20[%c0_138, %c16_139] : memref<16x96xf32, #tpu.memory_space<vmem>>, vector<8x16xf32>
    %c0_140 = arith.constant 0 : index
    %c48_141 = arith.constant 48 : index
    %234 = vector.load %arg20[%c0_140, %c48_141] : memref<16x96xf32, #tpu.memory_space<vmem>>, vector<8x16xf32>
    %c0_142 = arith.constant 0 : index
    %c80_143 = arith.constant 80 : index
    %235 = vector.load %arg20[%c0_142, %c80_143] : memref<16x96xf32, #tpu.memory_space<vmem>>, vector<8x16xf32>
    %cst_144 = arith.constant dense<0.000000e+00> : vector<8x8xf32>
    %236 = tpu.matmul %233, %234, %cst_144 {dimension_numbers = #tpu.dot_dimension_numbers<[1], [1], [0], [0], [0, 0, 1, 0], [], []>} : vector<8x16xf32>, vector<8x16xf32>, vector<8x8xf32> -> vector<8x8xf32>
    %cst_145 = arith.constant 2.500000e-01 : f32
    %237 = vector.broadcast %cst_145 : f32 to vector<8x8xf32>
    %238 = arith.mulf %236, %237 : vector<8x8xf32>
    %239 = vector.broadcast %213 : vector<1x8xf32> to vector<8x8xf32>
    %240 = arith.addf %238, %239 : vector<8x8xf32>
    %cst_146 = arith.constant dense<0xFF800000> : vector<8xf32>
    %241 = vector.multi_reduction <maximumf>, %240, %cst_146 [1] : vector<8x8xf32> to vector<8xf32>
    %242 = vector.shape_cast %241 : vector<8xf32> to vector<8x1xf32>
    %243 = vector.broadcast %242 : vector<8x1xf32> to vector<8x8xf32>
    %244 = arith.subf %240, %243 : vector<8x8xf32>
    %245 = math.exp %244 : vector<8x8xf32>
    %cst_147 = arith.constant dense<0.000000e+00> : vector<8xf32>
    %246 = vector.multi_reduction <add>, %245, %cst_147 [1] : vector<8x8xf32> to vector<8xf32>
    %247 = vector.shape_cast %246 : vector<8xf32> to vector<8x1xf32>
    %248 = vector.broadcast %247 : vector<8x1xf32> to vector<8x8xf32>
    %249 = arith.divf %245, %248 : vector<8x8xf32>
    %cst_148 = arith.constant dense<0.000000e+00> : vector<8x16xf32>
    %250 = tpu.matmul %249, %235, %cst_148 {dimension_numbers = #tpu.dot_dimension_numbers<[1], [0], [0], [1], [0, 0, 1, 1], [], []>} : vector<8x8xf32>, vector<8x16xf32>, vector<8x16xf32> -> vector<8x16xf32>
    %c0_149 = arith.constant 0 : index
    %c16_150 = arith.constant 16 : index
    %251 = vector.load %arg21[%c0_149, %c16_150] : memref<16x32xf32, #tpu.memory_space<vmem>>, vector<8x16xf32>
    tpu.vector_store %arg21[%c0_149, %c16_150], %250 {strides = array<i32>} : memref<16x32xf32, #tpu.memory_space<vmem>>, vector<8x16xf32>,
    %252 = vector.extract_strided_slice %29 {offsets = [1, 0], sizes = [1, 8], strides = [1, 1]} : vector<2x8xf32> to vector<1x8xf32>
    %c8_151 = arith.constant 8 : index
    %c0_152 = arith.constant 0 : index
    %253 = vector.load %arg20[%c8_151, %c0_152] : memref<16x96xf32, #tpu.memory_space<vmem>>, vector<8x16xf32>
    %c8_153 = arith.constant 8 : index
    %c32_154 = arith.constant 32 : index
    %254 = vector.load %arg20[%c8_153, %c32_154] : memref<16x96xf32, #tpu.memory_space<vmem>>, vector<8x16xf32>
    %c8_155 = arith.constant 8 : index
    %c64_156 = arith.constant 64 : index
    %255 = vector.load %arg20[%c8_155, %c64_156] : memref<16x96xf32, #tpu.memory_space<vmem>>, vector<8x16xf32>
    %cst_157 = arith.constant dense<0.000000e+00> : vector<8x8xf32>
    %256 = tpu.matmul %253, %254, %cst_157 {dimension_numbers = #tpu.dot_dimension_numbers<[1], [1], [0], [0], [0, 0, 1, 0], [], []>} : vector<8x16xf32>, vector<8x16xf32>, vector<8x8xf32> -> vector<8x8xf32>
    %cst_158 = arith.constant 2.500000e-01 : f32
    %257 = vector.broadcast %cst_158 : f32 to vector<8x8xf32>
    %258 = arith.mulf %256, %257 : vector<8x8xf32>
    %259 = vector.broadcast %252 : vector<1x8xf32> to vector<8x8xf32>
    %260 = arith.addf %258, %259 : vector<8x8xf32>
    %cst_159 = arith.constant dense<0xFF800000> : vector<8xf32>
    %261 = vector.multi_reduction <maximumf>, %260, %cst_159 [1] : vector<8x8xf32> to vector<8xf32>
    %262 = vector.shape_cast %261 : vector<8xf32> to vector<8x1xf32>
    %263 = vector.broadcast %262 : vector<8x1xf32> to vector<8x8xf32>
    %264 = arith.subf %260, %263 : vector<8x8xf32>
    %265 = math.exp %264 : vector<8x8xf32>
    %cst_160 = arith.constant dense<0.000000e+00> : vector<8xf32>
    %266 = vector.multi_reduction <add>, %265, %cst_160 [1] : vector<8x8xf32> to vector<8xf32>
    %267 = vector.shape_cast %266 : vector<8xf32> to vector<8x1xf32>
    %268 = vector.broadcast %267 : vector<8x1xf32> to vector<8x8xf32>
    %269 = arith.divf %265, %268 : vector<8x8xf32>
    %cst_161 = arith.constant dense<0.000000e+00> : vector<8x16xf32>
    %270 = tpu.matmul %269, %255, %cst_161 {dimension_numbers = #tpu.dot_dimension_numbers<[1], [0], [0], [1], [0, 0, 1, 1], [], []>} : vector<8x8xf32>, vector<8x16xf32>, vector<8x16xf32> -> vector<8x16xf32>
    %c8_162 = arith.constant 8 : index
    %c0_163 = arith.constant 0 : index
    %271 = vector.load %arg21[%c8_162, %c0_163] : memref<16x32xf32, #tpu.memory_space<vmem>>, vector<8x16xf32>
    tpu.vector_store %arg21[%c8_162, %c0_163], %270 {strides = array<i32>} : memref<16x32xf32, #tpu.memory_space<vmem>>, vector<8x16xf32>,
    %c8_164 = arith.constant 8 : index
    %c16_165 = arith.constant 16 : index
    %272 = vector.load %arg20[%c8_164, %c16_165] : memref<16x96xf32, #tpu.memory_space<vmem>>, vector<8x16xf32>
    %c8_166 = arith.constant 8 : index
    %c48_167 = arith.constant 48 : index
    %273 = vector.load %arg20[%c8_166, %c48_167] : memref<16x96xf32, #tpu.memory_space<vmem>>, vector<8x16xf32>
    %c8_168 = arith.constant 8 : index
    %c80_169 = arith.constant 80 : index
    %274 = vector.load %arg20[%c8_168, %c80_169] : memref<16x96xf32, #tpu.memory_space<vmem>>, vector<8x16xf32>
    %cst_170 = arith.constant dense<0.000000e+00> : vector<8x8xf32>
    %275 = tpu.matmul %272, %273, %cst_170 {dimension_numbers = #tpu.dot_dimension_numbers<[1], [1], [0], [0], [0, 0, 1, 0], [], []>} : vector<8x16xf32>, vector<8x16xf32>, vector<8x8xf32> -> vector<8x8xf32>
    %cst_171 = arith.constant 2.500000e-01 : f32
    %276 = vector.broadcast %cst_171 : f32 to vector<8x8xf32>
    %277 = arith.mulf %275, %276 : vector<8x8xf32>
    %278 = vector.broadcast %252 : vector<1x8xf32> to vector<8x8xf32>
    %279 = arith.addf %277, %278 : vector<8x8xf32>
    %cst_172 = arith.constant dense<0xFF800000> : vector<8xf32>
    %280 = vector.multi_reduction <maximumf>, %279, %cst_172 [1] : vector<8x8xf32> to vector<8xf32>
    %281 = vector.shape_cast %280 : vector<8xf32> to vector<8x1xf32>
    %282 = vector.broadcast %281 : vector<8x1xf32> to vector<8x8xf32>
    %283 = arith.subf %279, %282 : vector<8x8xf32>
    %284 = math.exp %283 : vector<8x8xf32>
    %cst_173 = arith.constant dense<0.000000e+00> : vector<8xf32>
    %285 = vector.multi_reduction <add>, %284, %cst_173 [1] : vector<8x8xf32> to vector<8xf32>
    %286 = vector.shape_cast %285 : vector<8xf32> to vector<8x1xf32>
    %287 = vector.broadcast %286 : vector<8x1xf32> to vector<8x8xf32>
    %288 = arith.divf %284, %287 : vector<8x8xf32>
    %cst_174 = arith.constant dense<0.000000e+00> : vector<8x16xf32>
    %289 = tpu.matmul %288, %274, %cst_174 {dimension_numbers = #tpu.dot_dimension_numbers<[1], [0], [0], [1], [0, 0, 1, 1], [], []>} : vector<8x8xf32>, vector<8x16xf32>, vector<8x16xf32> -> vector<8x16xf32>
    %c8_175 = arith.constant 8 : index
    %c16_176 = arith.constant 16 : index
    %290 = vector.load %arg21[%c8_175, %c16_176] : memref<16x32xf32, #tpu.memory_space<vmem>>, vector<8x16xf32>
    tpu.vector_store %arg21[%c8_175, %c16_176], %289 {strides = array<i32>} : memref<16x32xf32, #tpu.memory_space<vmem>>, vector<8x16xf32>,
    %c0_177 = arith.constant 0 : index
    %c0_178 = arith.constant 0 : index
    %291 = vector.load %arg21[%c0_177, %c0_178] : memref<16x32xf32, #tpu.memory_space<vmem>>, vector<16x32xf32>
    %c1_179 = arith.constant 1 : index
    %c0_180 = arith.constant 0 : index
    %c0_181 = arith.constant 0 : index
    %292 = vector.load %arg5[%c1_179, %c0_180, %c0_181] : memref<2x32x32xf32, #tpu.memory_space<vmem>>, vector<1x32x32xf32>
    %293 = vector.shape_cast %292 : vector<1x32x32xf32> to vector<32x32xf32>
    %cst_182 = arith.constant dense<0.000000e+00> : vector<16x32xf32>
    %294 = tpu.matmul %291, %293, %cst_182 {dimension_numbers = #tpu.dot_dimension_numbers<[1], [0], [0], [1], [0, 0, 1, 1], [], []>} : vector<16x32xf32>, vector<32x32xf32>, vector<16x32xf32> -> vector<16x32xf32>
    %c1_183 = arith.constant 1 : index
    %c0_184 = arith.constant 0 : index
    %c0_185 = arith.constant 0 : index
    %295 = vector.load %arg6[%c1_183, %c0_184, %c0_185] : memref<2x1x32xf32, #tpu.memory_space<vmem>>, vector<1x1x32xf32>
    %296 = vector.shape_cast %295 : vector<1x1x32xf32> to vector<1x32xf32>
    %297 = vector.broadcast %296 : vector<1x32xf32> to vector<16x32xf32>
    %298 = arith.addf %294, %297 : vector<16x32xf32>
    %299 = arith.addf %204, %298 : vector<16x32xf32>
    %c1_186 = arith.constant 1 : index
    %c0_187 = arith.constant 0 : index
    %c0_188 = arith.constant 0 : index
    %300 = vector.load %arg11[%c1_186, %c0_187, %c0_188] : memref<2x1x32xf32, #tpu.memory_space<vmem>>, vector<1x1x32xf32>
    %301 = vector.shape_cast %300 : vector<1x1x32xf32> to vector<1x32xf32>
    %c1_189 = arith.constant 1 : index
    %c0_190 = arith.constant 0 : index
    %c0_191 = arith.constant 0 : index
    %302 = vector.load %arg12[%c1_189, %c0_190, %c0_191] : memref<2x1x32xf32, #tpu.memory_space<vmem>>, vector<1x1x32xf32>
    %303 = vector.shape_cast %302 : vector<1x1x32xf32> to vector<1x32xf32>
    %cst_192 = arith.constant dense<0.000000e+00> : vector<16xf32>
    %304 = vector.multi_reduction <add>, %299, %cst_192 [1] : vector<16x32xf32> to vector<16xf32>
    %305 = vector.shape_cast %304 : vector<16xf32> to vector<16x1xf32>
    %cst_193 = arith.constant 3.200000e+01 : f32
    %306 = vector.broadcast %cst_193 : f32 to vector<16x1xf32>
    %307 = arith.divf %305, %306 : vector<16x1xf32>
    %308 = vector.broadcast %307 : vector<16x1xf32> to vector<16x32xf32>
    %309 = arith.subf %299, %308 : vector<16x32xf32>
    %310 = arith.mulf %309, %309 : vector<16x32xf32>
    %cst_194 = arith.constant dense<0.000000e+00> : vector<16xf32>
    %311 = vector.multi_reduction <add>, %310, %cst_194 [1] : vector<16x32xf32> to vector<16xf32>
    %312 = vector.shape_cast %311 : vector<16xf32> to vector<16x1xf32>
    %cst_195 = arith.constant 3.200000e+01 : f32
    %313 = vector.broadcast %cst_195 : f32 to vector<16x1xf32>
    %314 = arith.divf %312, %313 : vector<16x1xf32>
    %315 = vector.broadcast %307 : vector<16x1xf32> to vector<16x32xf32>
    %316 = arith.subf %299, %315 : vector<16x32xf32>
    %cst_196 = arith.constant 9.99999996E-13 : f32
    %317 = vector.broadcast %cst_196 : f32 to vector<16x1xf32>
    %318 = arith.addf %314, %317 : vector<16x1xf32>
    %319 = math.rsqrt %318 : vector<16x1xf32>
    %320 = vector.broadcast %319 : vector<16x1xf32> to vector<16x32xf32>
    %321 = arith.mulf %316, %320 : vector<16x32xf32>
    %322 = vector.broadcast %301 : vector<1x32xf32> to vector<16x32xf32>
    %323 = arith.mulf %321, %322 : vector<16x32xf32>
    %324 = vector.broadcast %303 : vector<1x32xf32> to vector<16x32xf32>
    %325 = arith.addf %323, %324 : vector<16x32xf32>
    %c1_197 = arith.constant 1 : index
    %c0_198 = arith.constant 0 : index
    %c0_199 = arith.constant 0 : index
    %326 = vector.load %arg7[%c1_197, %c0_198, %c0_199] : memref<2x32x64xf32, #tpu.memory_space<vmem>>, vector<1x32x64xf32>
    %327 = vector.shape_cast %326 : vector<1x32x64xf32> to vector<32x64xf32>
    %cst_200 = arith.constant dense<0.000000e+00> : vector<16x64xf32>
    %328 = tpu.matmul %325, %327, %cst_200 {dimension_numbers = #tpu.dot_dimension_numbers<[1], [0], [0], [1], [0, 0, 1, 1], [], []>} : vector<16x32xf32>, vector<32x64xf32>, vector<16x64xf32> -> vector<16x64xf32>
    %c1_201 = arith.constant 1 : index
    %c0_202 = arith.constant 0 : index
    %c0_203 = arith.constant 0 : index
    %329 = vector.load %arg8[%c1_201, %c0_202, %c0_203] : memref<2x1x64xf32, #tpu.memory_space<vmem>>, vector<1x1x64xf32>
    %330 = vector.shape_cast %329 : vector<1x1x64xf32> to vector<1x64xf32>
    %331 = vector.broadcast %330 : vector<1x64xf32> to vector<16x64xf32>
    %332 = arith.addf %328, %331 : vector<16x64xf32>
    %cst_204 = arith.constant 5.000000e-01 : f32
    %333 = vector.broadcast %cst_204 : f32 to vector<16x64xf32>
    %334 = arith.mulf %333, %332 : vector<16x64xf32>
    %cst_205 = arith.constant 4.471500e-02 : f32
    %335 = vector.broadcast %cst_205 : f32 to vector<16x64xf32>
    %336 = arith.mulf %335, %332 : vector<16x64xf32>
    %337 = arith.mulf %336, %332 : vector<16x64xf32>
    %338 = arith.mulf %337, %332 : vector<16x64xf32>
    %339 = arith.addf %332, %338 : vector<16x64xf32>
    %cst_206 = arith.constant 0.797884583 : f32
    %340 = vector.broadcast %cst_206 : f32 to vector<16x64xf32>
    %341 = arith.mulf %340, %339 : vector<16x64xf32>
    %342 = math.tanh %341 : vector<16x64xf32>
    %cst_207 = arith.constant 1.000000e+00 : f32
    %343 = vector.broadcast %cst_207 : f32 to vector<16x64xf32>
    %344 = arith.addf %343, %342 : vector<16x64xf32>
    %345 = arith.mulf %334, %344 : vector<16x64xf32>
    %c1_208 = arith.constant 1 : index
    %c0_209 = arith.constant 0 : index
    %c0_210 = arith.constant 0 : index
    %346 = vector.load %arg9[%c1_208, %c0_209, %c0_210] : memref<2x64x32xf32, #tpu.memory_space<vmem>>, vector<1x64x32xf32>
    %347 = vector.shape_cast %346 : vector<1x64x32xf32> to vector<64x32xf32>
    %cst_211 = arith.constant dense<0.000000e+00> : vector<16x32xf32>
    %348 = tpu.matmul %345, %347, %cst_211 {dimension_numbers = #tpu.dot_dimension_numbers<[1], [0], [0], [1], [0, 0, 1, 1], [], []>} : vector<16x64xf32>, vector<64x32xf32>, vector<16x32xf32> -> vector<16x32xf32>
    %c1_212 = arith.constant 1 : index
    %c0_213 = arith.constant 0 : index
    %c0_214 = arith.constant 0 : index
    %349 = vector.load %arg10[%c1_212, %c0_213, %c0_214] : memref<2x1x32xf32, #tpu.memory_space<vmem>>, vector<1x1x32xf32>
    %350 = vector.shape_cast %349 : vector<1x1x32xf32> to vector<1x32xf32>
    %351 = vector.broadcast %350 : vector<1x32xf32> to vector<16x32xf32>
    %352 = arith.addf %348, %351 : vector<16x32xf32>
    %353 = arith.addf %325, %352 : vector<16x32xf32>
    %c1_215 = arith.constant 1 : index
    %c0_216 = arith.constant 0 : index
    %c0_217 = arith.constant 0 : index
    %354 = vector.load %arg13[%c1_215, %c0_216, %c0_217] : memref<2x1x32xf32, #tpu.memory_space<vmem>>, vector<1x1x32xf32>
    %355 = vector.shape_cast %354 : vector<1x1x32xf32> to vector<1x32xf32>
    %c1_218 = arith.constant 1 : index
    %c0_219 = arith.constant 0 : index
    %c0_220 = arith.constant 0 : index
    %356 = vector.load %arg14[%c1_218, %c0_219, %c0_220] : memref<2x1x32xf32, #tpu.memory_space<vmem>>, vector<1x1x32xf32>
    %357 = vector.shape_cast %356 : vector<1x1x32xf32> to vector<1x32xf32>
    %cst_221 = arith.constant dense<0.000000e+00> : vector<16xf32>
    %358 = vector.multi_reduction <add>, %353, %cst_221 [1] : vector<16x32xf32> to vector<16xf32>
    %359 = vector.shape_cast %358 : vector<16xf32> to vector<16x1xf32>
    %cst_222 = arith.constant 3.200000e+01 : f32
    %360 = vector.broadcast %cst_222 : f32 to vector<16x1xf32>
    %361 = arith.divf %359, %360 : vector<16x1xf32>
    %362 = vector.broadcast %361 : vector<16x1xf32> to vector<16x32xf32>
    %363 = arith.subf %353, %362 : vector<16x32xf32>
    %364 = arith.mulf %363, %363 : vector<16x32xf32>
    %cst_223 = arith.constant dense<0.000000e+00> : vector<16xf32>
    %365 = vector.multi_reduction <add>, %364, %cst_223 [1] : vector<16x32xf32> to vector<16xf32>
    %366 = vector.shape_cast %365 : vector<16xf32> to vector<16x1xf32>
    %cst_224 = arith.constant 3.200000e+01 : f32
    %367 = vector.broadcast %cst_224 : f32 to vector<16x1xf32>
    %368 = arith.divf %366, %367 : vector<16x1xf32>
    %369 = vector.broadcast %361 : vector<16x1xf32> to vector<16x32xf32>
    %370 = arith.subf %353, %369 : vector<16x32xf32>
    %cst_225 = arith.constant 9.99999996E-13 : f32
    %371 = vector.broadcast %cst_225 : f32 to vector<16x1xf32>
    %372 = arith.addf %368, %371 : vector<16x1xf32>
    %373 = math.rsqrt %372 : vector<16x1xf32>
    %374 = vector.broadcast %373 : vector<16x1xf32> to vector<16x32xf32>
    %375 = arith.mulf %370, %374 : vector<16x32xf32>
    %376 = vector.broadcast %355 : vector<1x32xf32> to vector<16x32xf32>
    %377 = arith.mulf %375, %376 : vector<16x32xf32>
    %378 = vector.broadcast %357 : vector<1x32xf32> to vector<16x32xf32>
    %379 = arith.addf %377, %378 : vector<16x32xf32>
    %380 = vector.extract_strided_slice %379 {offsets = [0, 0], sizes = [1, 32], strides = [1, 1]} : vector<16x32xf32> to vector<1x32xf32>
    %381 = vector.extract_strided_slice %379 {offsets = [8, 0], sizes = [1, 32], strides = [1, 1]} : vector<16x32xf32> to vector<1x32xf32>
    %382 = tpu.concatenate %380, %381 in 0 : vector<1x32xf32>, vector<1x32xf32> -> vector<2x32xf32>
    %c0_226 = arith.constant 0 : index
    %c0_227 = arith.constant 0 : index
    %383 = vector.load %arg15[%c0_226, %c0_227] : memref<32x32xf32, #tpu.memory_space<vmem>>, vector<32x32xf32>
    %cst_228 = arith.constant dense<0.000000e+00> : vector<2x32xf32>
    %384 = tpu.matmul %382, %383, %cst_228 {dimension_numbers = #tpu.dot_dimension_numbers<[1], [0], [0], [1], [0, 0, 1, 1], [], []>} : vector<2x32xf32>, vector<32x32xf32>, vector<2x32xf32> -> vector<2x32xf32>
    %c0_229 = arith.constant 0 : index
    %c0_230 = arith.constant 0 : index
    %385 = vector.load %arg16[%c0_229, %c0_230] : memref<1x32xf32, #tpu.memory_space<vmem>>, vector<1x32xf32>
    %386 = vector.broadcast %385 : vector<1x32xf32> to vector<2x32xf32>
    %387 = arith.addf %384, %386 : vector<2x32xf32>
    %388 = math.tanh %387 : vector<2x32xf32>
    %c0_231 = arith.constant 0 : index
    %c0_232 = arith.constant 0 : index
    %389 = vector.load %arg18[%c0_231, %c0_232] : memref<2x32xf32, #tpu.memory_space<vmem>>, vector<2x32xf32>
    %cst_233 = arith.constant 0.699999988 : f32
    %390 = vector.broadcast %cst_233 : f32 to vector<2x32xf32>
    %391 = arith.cmpf olt, %389, %390 : vector<2x32xf32>
    %cst_234 = arith.constant 1.42857146 : f32
    %392 = vector.broadcast %cst_234 : f32 to vector<2x32xf32>
    %393 = arith.mulf %388, %392 : vector<2x32xf32>
    %cst_235 = arith.constant 0.000000e+00 : f32
    %394 = vector.broadcast %cst_235 : f32 to vector<2x32xf32>
    %395 = arith.select %391, %393, %394 : vector<2x32xi1>, vector<2x32xf32>
    %c0_236 = arith.constant 0 : index
    %c0_237 = arith.constant 0 : index
    %396 = vector.load %arg19[%c0_236, %c0_237] : memref<2x32xf32, #tpu.memory_space<vmem>>, vector<2x32xf32>
    tpu.vector_store %arg19[%c0_236, %c0_237], %395 {strides = array<i32>} : memref<2x32xf32, #tpu.memory_space<vmem>>, vector<2x32xf32>,
    return
  }
}

</mosaic_0001>

<bundles_post_ra>
// kernel: tpu_custom_call.1
= control target key start
LH: loop header
LB: loop body
LE: loop exit
PB: predicated region body
PF: predicated region fallthrough
CT: control target
= control target key end

     0   :  { %s3746_s0 = inlined_call_operand.hbm [shape: f32[16,32], index: 0, kind: input, shape index: {}]   ;;  %s3747_s1 = inlined_call_operand.hbm [shape: f32[1,32], index: 1, kind: input, shape index: {}]   ;;  %s3748_s2 = inlined_call_operand.hbm [shape: f32[1,32], index: 2, kind: input, shape index: {}]   ;;  %s3749_s3 = inlined_call_operand.vmem [shape: f32[2,32,96], index: 3, kind: input, shape index: {}]   ;;  %s3750_s4 = inlined_call_operand.vmem [shape: f32[2,1,96], index: 4, kind: input, shape index: {}]   ;;  %s3751_s5 = inlined_call_operand.vmem [shape: f32[2,32,32], index: 5, kind: input, shape index: {}]   ;;  %s3752_s6 = inlined_call_operand.vmem [shape: f32[2,1,32], index: 6, kind: input, shape index: {}]   ;;  %s3753_s7 = inlined_call_operand.vmem [shape: f32[2,32,64], index: 7, kind: input, shape index: {}]   ;;  %s3754_s8 = inlined_call_operand.vmem [shape: f32[2,1,64], index: 8, kind: input, shape index: {}]   ;;  %s3755_s9 = inlined_call_operand.vmem [shape: f32[2,64,32], index: 9, kind: input, shape index: {}]   ;;  %s3756_s10 = inlined_call_operand.vmem [shape: f32[2,1,32], index: 10, kind: input, shape index: {}]   ;;  %s3757_s11 = inlined_call_operand.vmem [shape: f32[2,1,32], index: 11, kind: input, shape index: {}]   ;;  %s3758_s12 = inlined_call_operand.vmem [shape: f32[2,1,32], index: 12, kind: input, shape index: {}]   ;;  %s3759_s13 = inlined_call_operand.vmem [shape: f32[2,1,32], index: 13, kind: input, shape index: {}]   ;;  %s3760_s14 = inlined_call_operand.vmem [shape: f32[2,1,32], index: 14, kind: input, shape index: {}]   ;;  %s3761_s15 = inlined_call_operand.hbm [shape: f32[32,32], index: 15, kind: input, shape index: {}]   ;;  %s3762_s16 = inlined_call_operand.vmem [shape: f32[1,32], index: 16, kind: input, shape index: {}]   ;;  %s3763_s17 = inlined_call_operand.vmem [shape: f32[2,8], index: 17, kind: input, shape index: {}]   ;;  %s3764_s18 = inlined_call_operand.vmem [shape: f32[2,32], index: 18, kind: input, shape index: {}]   ;;  %s3765_s19 = inlined_call_operand.hbm [shape: f32[2,32], index: 19, kind: output, shape index: {}]  }
   0x1   :  { %3767 = sst [smem:[#allocation17_spill]] %s3746_s0 }
   0x2   :  { %3768 = sst [smem:[#allocation18_spill]] %s3747_s1 }
   0x3   :  { %3769 = sst [smem:[#allocation19_spill]] %s3748_s2 }
   0x4   :  { %3770 = sst [smem:[#allocation20_spill]] %s3749_s3 }
   0x5   :  { %24 = vsyncpa [#allocation5], 0 }
   0x6   :  { %25 = vsyncpa [#allocation8], 0 }
   0x7   :  { %26 = vsyncpa [#allocation11], 0 }
   0x8   :  { %27 = vsyncpa [#allocation6], 0  ;;  %s3204_s0 = smov [#allocation7]   ;;  %s3205_s20 = smov [#allocation4]  }
   0x9   :  { %s46_s30 = sshll.u32 %s3204_s0, 4  ;;  %s33_s21 = sshll.u32 %s3205_s20, 4  ;;  %s47_s30 = int_to_ptr.vmem [resolvable:$true] %s46_s30  ;;  %s34_s21 = int_to_ptr.vmem [resolvable:$true] %s33_s21 }
   0xa   :  { %s3104_s1 = scalar_lea.vmem %s47_s30, 16  ;;  %s3108_s22 = scalar_lea.vmem %s47_s30, 32 }
   0xb   :  { %p3105_p0 = scmp.ne.s32.totalorder %s47_s30, %s3104_s1  ;;  %p3109_p1 = scmp.lt.s32.totalorder %s47_s30, %s47_s30 }
   0xc   :  { %p3110_p2 = scmp.lt.s32.totalorder %s3108_s22, %s3104_s1 }
   0xe   :  { %p3111_p3 = por %p3110_p2, %p3109_p1 }
  0x10   :  { %p3112_p4 = pnand %p3111_p3, %p3105_p0 }
  0x12   :  { %3115 = shalt.err (!%p3112_p4)
}
  0x13   :  { %s3771_s24 = sld [smem:[#allocation18_spill]]  ;;  %s3124_s25 = scalar_lea.vmem %s34_s21, 256 }
  0x14   :  { %p3125_p5 = scmp.ne.s32.totalorder %s34_s21, %s3124_s25  ;;  %p3129_p6 = scmp.lt.s32.totalorder %s34_s21, %s34_s21 }
  0x15   :  { %p3130_p7 = scmp.lt.s32.totalorder %s3124_s25, %s3124_s25 }
  0x17   :  { %p3131_p8 = por %p3130_p7, %p3129_p6 }
  0x19   :  { %49 = dma.hbm_to_vmem [thread:$0]  %s3771_s24, 16, %s47_s30, [#allocation8]  }
  0x1a   :  { %p3132_p9 = pnand %p3131_p8, %p3125_p5 }
  0x1c   :  { %3135 = shalt.err (!%p3132_p9)
}
  0x1d   :  { %s3206_s3 = smov 128   ;;  %s3207_s26 = smov 8  }
  0x1e   :  { %s3772_s29 = sld [smem:[#allocation17_spill]]  ;;  %s3208_s0 = smov [#allocation9]  }
  0x1f   :  { %s56_s20 = sshll.u32 %s3208_s0, 4  ;;  %s3209_s1 = smov [#allocation10]   ;;  %s57_s20 = int_to_ptr.vmem [resolvable:$true] %s56_s20 }
  0x20   :  { %s89_s22 = sshll.u32 %s3209_s1, 4  ;;  %s3144_s30 = scalar_lea.vmem %s57_s20, 16  ;;  %s90_s22 = int_to_ptr.vmem [resolvable:$true] %s89_s22 }
  0x21   :  { %p3145_p10 = scmp.ne.s32.totalorder %s57_s20, %s3144_s30  ;;  %s3148_s2 = scalar_lea.vmem %s57_s20, 32 }
  0x22   :  { %p3149_p11 = scmp.lt.s32.totalorder %s57_s20, %s57_s20  ;;  %p3150_p12 = scmp.lt.s32.totalorder %s3148_s2, %s3144_s30 }
  0x24   :  { %39 = dma.hbm_to_vmem [thread:$0]  %s3772_s29, 256, %s34_s21, [#allocation5], %s3206_s3, %s3206_s3, %s3207_s26  }
  0x25   :  { %p3151_p13 = por %p3150_p12, %p3149_p11 }
  0x27   :  { %p3152_p0 = pnand %p3151_p13, %p3145_p10 }
  0x29   :  { %3155 = shalt.err (!%p3152_p0)
}
  0x2a   :  { %s3773_s25 = sld [smem:[#allocation19_spill]]  ;;  %s3164_s27 = scalar_lea.vmem %s90_s22, 512 }
  0x2b   :  { %p3165_p1 = scmp.ne.s32.totalorder %s90_s22, %s3164_s27  ;;  %p3169_p2 = scmp.lt.s32.totalorder %s90_s22, %s90_s22 }
  0x2c   :  { %p3170_p3 = scmp.lt.s32.totalorder %s3164_s27, %s3164_s27 }
  0x2e   :  { %p3171_p4 = por %p3170_p3, %p3169_p2 }
  0x30   :  { %59 = dma.hbm_to_vmem [thread:$0]  %s3773_s25, 16, %s57_s20, [#allocation8]  }
  0x31   :  { %p3172_p5 = pnand %p3171_p4, %p3165_p1 }
  0x33   :  { %3175 = shalt.err (!%p3172_p5)
}
  0x34   :  { %95 = dma.hbm_to_vmem [thread:$0]  %s3761_s15, 512, %s90_s22, [#allocation11], %s3206_s3, %s3206_s3, %s3207_s26  }
  0x35   :  { %3196 = dma.done.wait [#allocation5], 256  }
  0x36   :  { %3197 = vsyncadd [#allocation5], 4294967040 }
  0x37   :  { %3198 = dma.done.wait [#allocation8], 32  }
  0x38   :  { %3199 = vsyncadd [#allocation8], 4294967264 }
  0x39   :  { %3200 = dma.done.wait [#allocation11], 512  }
  0x3a   :  { %3201 = vsyncadd [#allocation11], 4294966784  ;;  %vm118_vm0 = vcmask 261120   ;;  %v114_v0 = vld [vmem:[#allocation4] sm:$0xff]  ;;  %v115_v1 = vld [vmem:[#allocation4 + $0x8] sm:$0xff]  ;;  %s3774_s26 = sld [smem:[#allocation20_spill]]  ;;  %v340_v45 = vlaneseq }
  0x3b   :  { %v119_v2 = vsel %vm118_vm0, %v114_v0, 0.0  ;;  %v122_v3 = vsel %vm118_vm0, %v115_v1, 0.0  ;;  %v2643_v25 = vld [vmem:[#allocation7] ss:$0 sm:$0xff]  ;;  %v2644_v27 = vld [vmem:[#allocation9] ss:$0 sm:$0xff] }
  0x3c   :  { %120 = vadd.xlane.f32.xlu0 %v119_v2  ;;  %v3210_v34 = vmov 0.0   ;;  %v2645_v35 = vld [vmem:[%s3750_s4] ss:$0 sm:$0xff]  ;;  %vm257_vm1 = vcmask 785408   ;;  %vm3211_vm2 = vmmov 0   ;;  %s3212_s24 = smov 96  }
  0x3d   :  { %2835 = vmatprep.subr.mxu1 %v3210_v34  ;;  %2837 = vmatprep.mubr.msk.f32.mxu1 %vm3211_vm2, %v3210_v34  ;;  %s3213_s25 = smov 80   ;;  %s3214_s27 = smov 112   ;;  %vm264_vm3 = vcmask 130048   ;;  %v162_v46 = vld [vmem:[%s3763_s17] sm:$0x3]  ;;  %v341_v48 = vshrl.u32 %v340_v45, 7 }
  0x3e   :  { %v163_v47 = vsub.f32 1.0, %v162_v46  ;;  %vm345_vm4 = vcmask 64512   ;;  %s3215_s17 = smov 64   ;;  %s3216_s15 = smov 48   ;;  %vm607_vm5 = vcmask 261248   ;;  %vm1220_vm6 = vcmask 523264  }
  0x3f   :  { %v342_v50 = vsub.s32 0, %v341_v48  ;;  %v690_v56 = vsub.s32 1, %v341_v48  ;;  %s3217_s23 = smov 16   ;;  %vm2533_vm7 = vcmask 1040384   ;;  %vm2624_vm9 = vcmask 254976  }
  0x40   :  { %123 = vadd.xlane.f32.xlu0 %v122_v3  ;;  %v168_v14 = vld [vmem:[%s3774_s26 + $0x18] sm:$0xff]  ;;  %v167_v15 = vld [vmem:[%s3774_s26 + $0x10] sm:$0xff]  ;;  %v166_v16 = vld [vmem:[%s3774_s26 + $0x8] sm:$0xff]  ;;  %v164_v49 = vmul.f32 -1e+09, %v163_v47 }
  0x41   :  { %2824 = vmatprep.subr.mxu0 %v168_v14  ;;  %v165_v17 = vld [vmem:[%s3774_s26] sm:$0xff] }
  0x42   :  { %2825 = vmatpush3.msra.mxu0 %v168_v14  ;;  %v3393_v51 = vrot.slane %v164_v49, %v342_v50  ;;  %v3397_v58 = vrot.slane %v164_v49, %v690_v56  ;;  %v959_v56 = vld [vmem:[%s3751_s5 + $0x10] sm:$0xff] }
  0x43   :  { %2826 = vmatprep.subr.mxu0 %v167_v15 }
  0x44   :  { %2827 = vmatpush3.msra.mxu0 %v167_v15 }
  0x45   :  { %2828 = vmatprep.subr.mxu0 %v166_v16 }
  0x46   :  { %2829 = vmatpush3.msra.mxu0 %v166_v16 }
  0x47   :  { %2830 = vmatprep.subr.mxu0 %v165_v17 }
  0x48   :  { %2831 = vmatpush3.msra.mxu0 %v165_v17 }
  0x49   :  { %2855 = vmatprep.subr.mxu0 %v3210_v34 }
  0xc5   :  { %v121_v4 = vpop.xlane.xlu0 %120 }
  0xc6   :  { %v126_v5 = vmul.f32 0.03125, %v121_v4 }
  0xc8   :  { %v128_v6 = vsub.f32 %v114_v0, %v126_v5 }
  0xc9   :  { %v124_v7 = vpop.xlane.xlu0 %123 }
  0xca   :  { %v127_v8 = vmul.f32 0.03125, %v124_v7  ;;  %v130_v9 = vmul.f32 %v128_v6, %v128_v6 }
  0xcc   :  { %v129_v10 = vsub.f32 %v115_v1, %v127_v8  ;;  %v132_v11 = vsel %vm118_vm0, %v130_v9, 0.0 }
  0xcd   :  { %133 = vadd.xlane.f32.xlu1 %v132_v11 }
  0xce   :  { %v131_v12 = vmul.f32 %v129_v10, %v129_v10 }
  0xd0   :  { %v135_v13 = vsel %vm118_vm0, %v131_v12, 0.0 }
  0xd1   :  { %136 = vadd.xlane.f32.xlu1 %v135_v13 }
 0x156   :  { %v134_v18 = vpop.xlane.xlu1 %133 }
 0x157   :  { %v138_v19 = vmul.f32 0.03125, %v134_v18 }
 0x159   :  { %v140_v20 = vadd.f32 1e-12, %v138_v19 }
 0x15a   :  { %v137_v21 = vpop.xlane.xlu1 %136 }
 0x15b   :  { %3034 = vrsqrt.f32 %v140_v20  ;;  %v139_v22 = vmul.f32 0.03125, %v137_v21 }
 0x15d   :  { %v141_v23 = vadd.f32 1e-12, %v139_v22 }
 0x15f   :  { %3036 = vrsqrt.f32 %v141_v23 }
 0x168   :  { %v3035_v24 = vpop.eup %3034 }
 0x169   :  { %v144_v26 = vmul.f32 %v3035_v24, %v128_v6 }
 0x16b   :  { %v152_v28 = vmul.f32 %v2643_v25, %v144_v26 }
 0x16c   :  { %v3037_v29 = vpop.eup %3036 }
 0x16d   :  { %v145_v30 = vmul.f32 %v3037_v29, %v129_v10  ;;  %v3347_v31 = vadd.f32 %v2644_v27, %v152_v28 }
 0x16f   :  { %v153_v32 = vmul.f32 %v2643_v25, %v145_v30  ;;  %2832 = vmatprep.mubr.msk.f32.mxu0 %vm118_vm0, %v3347_v31 }
 0x171   :  { %v3351_v33 = vadd.f32 %v2644_v27, %v153_v32 }
 0x173   :  { %2833 = vmatmul.mubr.msk.f32.vlgmr.msra.gmra.mxu0 %vm118_vm0, %v3351_v33 }
 0x174   :  { %2857 = vmatprep.mubr.msk.f32.mxu0 %vm3211_vm2, %v3210_v34 }
 0x233   :  { %v2834_v36 = vpop.f32.mrf.mxu0 }
 0x234   :  { %v254_v37 = vadd.f32 %v2834_v36, %v2645_v35 }
 0x235   :  { %v248_v38 = vpop.f32.mrf.mxu0 }
 0x236   :  { %259 = vst.msk [vmem:[#allocation2 + $0x8] sm:$0xff] %vm257_vm1, %v254_v37  ;;  %v249_v39 = vadd.f32 %v2645_v35, %v248_v38 }
 0x238   :  { %258 = vst.msk [vmem:[#allocation2] sm:$0xff] %vm257_vm1, %v249_v39 }
 0x23d   :  { %v3372_v41 = vld [vmem:[#allocation2 + $0x8] sm:$0xff] }
 0x23f   :  { %v3366_v40 = vld [vmem:[#allocation2] sm:$0xff] }
 0x240   :  { %262 = vrot.lane.b32.xlu0 %v3366_v40, %s3212_s24 }
 0x244   :  { %438 = vrot.lane.b32.xlu0 %v3366_v40, %s3213_s25 }
 0x248   :  { %611 = vrot.lane.b32.xlu0 %v3372_v41, %s3212_s24 }
 0x24c   :  { %783 = vrot.lane.b32.xlu0 %v3372_v41, %s3214_s27 }
 0x2b2   :  { %v263_v42 = vpop.permute.xlu0 %262 }
 0x2b3   :  { %2836 = vmatpush3.xpose.msk.msra.mxu1 %vm264_vm3, %v263_v42 }
 0x2b4   :  { %2840 = vmatprep.subr.mxu1 %v3210_v34 }
 0x2b6   :  { %2838 = vmatmul.mubr.msk.f32.vlgmr.msra.gmra.mxu1 %vm264_vm3, %v3366_v40  ;;  %v439_v43 = vpop.permute.xlu0 %438 }
 0x2b7   :  { %2842 = vmatprep.mubr.msk.f32.mxu1 %vm3211_vm2, %v3210_v34 }
 0x2ba   :  { %v612_v44 = vpop.permute.xlu0 %611 }
 0x2bb   :  { %2856 = vmatpush3.xpose.msk.msra.mxu0 %vm264_vm3, %v612_v44 }
 0x2bc   :  { %2865 = vmatprep.subr.mxu0 %v3210_v34 }
 0x2be   :  { %2858 = vmatmul.mubr.msk.f32.vlgmr.msra.gmra.mxu0 %vm264_vm3, %v3372_v41  ;;  %v784_v9 = vpop.permute.xlu0 %783 }
 0x2bf   :  { %2867 = vmatprep.mubr.msk.f32.mxu0 %vm3211_vm2, %v3210_v34 }
 0x376   :  { %v335_v52 = vpop.f32.mrf.mxu1 }
 0x377   :  { %v339_v53 = vmul.f32 0.25, %v335_v52 }
 0x378   :  { %v2839_v54 = vpop.f32.mrf.mxu1 }
 0x379   :  { %v344_v55 = vadd.f32 %v3393_v51, %v339_v53 }
 0x37b   :  { %v346_v57 = vsel %vm345_vm4, %v344_v55, -inf }
 0x37c   :  { %347 = vmax.xlane.f32.xlu1 %v346_v57  ;;  %v958_v57 = vld [vmem:[%s3751_s5 + $0x8] sm:$0xff] }
 0x37e   :  { %v683_v59 = vpop.f32.mrf.mxu0 }
 0x37f   :  { %v687_v60 = vmul.f32 0.25, %v683_v59 }
 0x380   :  { %v2859_v61 = vpop.f32.mrf.mxu0 }
 0x381   :  { %v692_v62 = vadd.f32 %v3397_v58, %v687_v60  ;;  %v957_v60 = vld [vmem:[%s3751_s5] sm:$0xff] }
 0x383   :  { %v693_v63 = vsel %vm345_vm4, %v692_v62, -inf }
 0x384   :  { %694 = vmax.xlane.f32.xlu0 %v693_v63 }
 0x38d   :  { %357 = vrot.lane.b32.xlu1 %v3366_v40, %s3215_s17 }
 0x405   :  { %v348_v0 = vpop.xlane.xlu1 %347 }
 0x406   :  { %v349_v1 = vsub.f32 %v344_v55, %v348_v0  ;;  %v960_v55 = vld [vmem:[%s3751_s5 + $0x18] sm:$0xff] }
 0x408   :  { %v350_v2 = vmul.f32 1.442695, %v349_v1 }
 0x409   :  { %v358_v3 = vpop.permute.xlu1 %357 }
 0x40a   :  { %3038 = vpow2.f32 %v350_v2  ;;  %2841 = vmatpush3.msra.mxu1 %v358_v3 }
 0x40b   :  { %2845 = vmatprep.subr.mxu1 %v3210_v34 }
 0x40d   :  { %v695_v12 = vpop.xlane.xlu0 %694 }
 0x40e   :  { %v696_v13 = vsub.f32 %v692_v62, %v695_v12 }
 0x410   :  { %v697_v14 = vmul.f32 1.442695, %v696_v13 }
 0x417   :  { %v3039_v4 = vpop.eup %3038 }
 0x418   :  { %v352_v5 = vsel %vm345_vm4, %v3039_v4, 0.0 }
 0x419   :  { %353 = vadd.xlane.f32.xlu1 %v352_v5 }
 0x42a   :  { %436 = vrot.lane.b32.xlu1 %v3366_v40, %s3214_s27 }
 0x42e   :  { %785 = vrot.lane.b32.xlu1 %v3372_v41, %s3213_s25 }
 0x4a2   :  { %v354_v6 = vpop.xlane.xlu1 %353 }
 0x4a3   :  { %3040 = vrcp.f32 %v354_v6  ;;  %v2660_v6 = vld [vmem:[%s3752_s6] ss:$0 sm:$0xff] }
 0x4a4   :  { %3042 = vpow2.f32 %v697_v14 }
 0x4a6   :  { %v437_v7 = vpop.permute.xlu1 %436 }
 0x4aa   :  { %v786_v8 = vpop.permute.xlu1 %785 }
 0x4ab   :  { %2866 = vmatpush3.xpose.msk.msra.mxu0 %vm264_vm3, %v786_v8 }
 0x4ac   :  { %2875 = vmatprep.subr.mxu0 %v960_v55 }
 0x4ae   :  { %2868 = vmatmul.mubr.msk.f32.vlgmr.msra.gmra.mxu0 %vm264_vm3, %v784_v9 }
 0x4af   :  { %2876 = vmatpush3.msra.mxu0 %v960_v55  ;;  %v2665_v55 = vld [vmem:[%s3754_s8] ss:$0 sm:$0xff] }
 0x4b0   :  { %v3041_v10 = vpop.eup %3040  ;;  %2877 = vmatprep.subr.mxu0 %v959_v56 }
 0x4b1   :  { %v356_v11 = vmul.f32 %v3041_v10, %v3039_v4  ;;  %v3043_v27 = vpop.eup %3042  ;;  %2878 = vmatpush3.msra.mxu0 %v959_v56 }
 0x4b2   :  { %v699_v28 = vsel %vm345_vm4, %v3043_v27, 0.0  ;;  %2879 = vmatprep.subr.mxu0 %v958_v57 }
 0x4b3   :  { %2843 = vmatmul.mubr.msk.f32.vlgmr.msra.gmra.mxu1 %vm345_vm4, %v356_v11  ;;  %2880 = vmatpush3.msra.mxu0 %v958_v57 }
 0x4b4   :  { %2846 = vmatpush3.xpose.msk.msra.mxu1 %vm264_vm3, %v439_v43  ;;  %2847 = vmatprep.mubr.msk.f32.mxu1 %vm3211_vm2, %v3210_v34 }
 0x4b5   :  { %2850 = vmatprep.subr.mxu1 %v3210_v34  ;;  %2881 = vmatprep.subr.mxu0 %v957_v60 }
 0x4b6   :  { %2882 = vmatpush3.msra.mxu0 %v957_v60 }
 0x4b7   :  { %2848 = vmatmul.mubr.msk.f32.vlgmr.msra.gmra.mxu1 %vm264_vm3, %v437_v7 }
 0x4b8   :  { %2852 = vmatprep.mubr.msk.f32.mxu1 %vm3211_vm2, %v3210_v34 }
 0x56e   :  { %v857_v15 = vpop.f32.mrf.mxu0 }
 0x56f   :  { %v861_v16 = vmul.f32 0.25, %v857_v15 }
 0x570   :  { %v2869_v17 = vpop.f32.mrf.mxu0 }
 0x571   :  { %v862_v18 = vadd.f32 %v861_v16, %v3397_v58 }
 0x573   :  { %v429_v19 = vpop.f32.mrf.mxu1  ;;  %v863_v20 = vsel %vm345_vm4, %v862_v18, -inf }
 0x574   :  { %433 = vst.msk [vmem:[#allocation3] sm:$0xff] %vm264_vm3, %v429_v19  ;;  %864 = vmax.xlane.f32.xlu0 %v863_v20 }
 0x575   :  { %v2844_v21 = vpop.f32.mrf.mxu1 }
 0x577   :  { %v510_v22 = vpop.f32.mrf.mxu1 }
 0x578   :  { %v514_v23 = vmul.f32 0.25, %v510_v22 }
 0x579   :  { %v2849_v24 = vpop.f32.mrf.mxu1 }
 0x57a   :  { %v515_v25 = vadd.f32 %v514_v23, %v3393_v51  ;;  %v1097_v24 = vld [vmem:[%s3753_s7 + $0x10] sm:$0xff] }
 0x57c   :  { %v516_v26 = vsel %vm345_vm4, %v515_v25, -inf }
 0x57d   :  { %517 = vmax.xlane.f32.xlu1 %v516_v26  ;;  %v1095_v26 = vld [vmem:[%s3753_s7] sm:$0xff] }
 0x581   :  { %700 = vadd.xlane.f32.xlu1 %v699_v28 }
 0x592   :  { %527 = vrot.lane.b32.xlu1 %v3366_v40, %s3216_s15 }
 0x596   :  { %874 = vrot.lane.b32.xlu1 %v3372_v41, %s3216_s15 }
 0x5fd   :  { %v865_v29 = vpop.xlane.xlu0 %864 }
 0x5fe   :  { %v866_v30 = vsub.f32 %v862_v18, %v865_v29 }
 0x600   :  { %v867_v32 = vmul.f32 1.442695, %v866_v30 }
 0x602   :  { %3044 = vpow2.f32 %v867_v32 }
 0x606   :  { %v518_v35 = vpop.xlane.xlu1 %517 }
 0x607   :  { %v519_v36 = vsub.f32 %v515_v25, %v518_v35  ;;  %v1096_v25 = vld [vmem:[%s3753_s7 + $0x8] sm:$0xff] }
 0x609   :  { %v520_v37 = vmul.f32 1.442695, %v519_v36 }
 0x60a   :  { %v701_v38 = vpop.xlane.xlu1 %700 }
 0x60b   :  { %3046 = vpow2.f32 %v520_v37  ;;  %v2663_v37 = vld [vmem:[%s3757_s11] ss:$0 sm:$0xff] }
 0x60e   :  { %v528_v39 = vpop.permute.xlu1 %527 }
 0x60f   :  { %v3045_v42 = vpop.eup %3044  ;;  %2851 = vmatpush3.msra.mxu1 %v528_v39  ;;  %v2664_v39 = vld [vmem:[%s3758_s12] ss:$0 sm:$0xff] }
 0x610   :  { %v869_v43 = vsel %vm345_vm4, %v3045_v42, 0.0  ;;  %2860 = vmatprep.subr.mxu1 %v3210_v34 }
 0x611   :  { %870 = vadd.xlane.f32.xlu0 %v869_v43 }
 0x618   :  { %v3047_v40 = vpop.eup %3046 }
 0x619   :  { %v522_v44 = vsel %vm345_vm4, %v3047_v40, 0.0 }
 0x61a   :  { %523 = vadd.xlane.f32.xlu0 %v522_v44 }
 0x630   :  { %704 = vrot.lane.b32.xlu0 %v3372_v41, %s3215_s17  ;;  %v875_v41 = vpop.permute.xlu1 %874 }
 0x69a   :  { %v871_v45 = vpop.xlane.xlu0 %870 }
 0x6a3   :  { %v524_v46 = vpop.xlane.xlu0 %523 }
 0x6a4   :  { %3048 = vrcp.f32 %v524_v46 }
 0x6a5   :  { %3050 = vrcp.f32 %v701_v38 }
 0x6a6   :  { %3052 = vrcp.f32 %v871_v45 }
 0x6a7   :  { %v705_v50 = vpop.permute.xlu0 %704 }
 0x6b1   :  { %v3049_v47 = vpop.eup %3048 }
 0x6b2   :  { %v526_v48 = vmul.f32 %v3049_v47, %v3047_v40  ;;  %v3051_v49 = vpop.eup %3050  ;;  %v1212_v47 = vld [vmem:[%s3755_s9 + $0x38] sm:$0xff] }
 0x6b3   :  { %v703_v52 = vmul.f32 %v3051_v49, %v3043_v27  ;;  %v3053_v53 = vpop.eup %3052  ;;  %2897 = vmatprep.subr.mxu0 %v1212_v47  ;;  %v1210_v49 = vld [vmem:[%s3755_s9 + $0x28] sm:$0xff] }
 0x6b4   :  { %2853 = vmatmul.mubr.msk.f32.vlgmr.msra.gmra.mxu1 %vm345_vm4, %v526_v48  ;;  %v873_v54 = vmul.f32 %v3053_v53, %v3045_v42  ;;  %v1211_v48 = vld [vmem:[%s3755_s9 + $0x30] sm:$0xff] }
 0x6b5   :  { %2861 = vmatpush3.msra.mxu1 %v705_v50  ;;  %2862 = vmatprep.mubr.msk.f32.mxu1 %vm3211_vm2, %v3210_v34  ;;  %v1209_v50 = vld [vmem:[%s3755_s9 + $0x20] sm:$0xff]  ;;  %v1207_v53 = vld [vmem:[%s3755_s9 + $0x10] sm:$0xff] }
 0x6b6   :  { %2870 = vmatprep.subr.mxu1 %v3210_v34 }
 0x6b8   :  { %2863 = vmatmul.mubr.msk.f32.vlgmr.msra.gmra.mxu1 %vm345_vm4, %v703_v52  ;;  %v1208_v52 = vld [vmem:[%s3755_s9 + $0x18] sm:$0xff] }
 0x6b9   :  { %2871 = vmatpush3.msra.mxu1 %v875_v41  ;;  %2872 = vmatprep.mubr.msk.f32.mxu1 %vm3211_vm2, %v3210_v34  ;;  %v1206_v41 = vld [vmem:[%s3755_s9 + $0x8] sm:$0xff] }
 0x6bc   :  { %2873 = vmatmul.mubr.msk.f32.vlgmr.msra.gmra.mxu1 %vm345_vm4, %v873_v54  ;;  %v1205_v54 = vld [vmem:[%s3755_s9] sm:$0xff] }
 0x774   :  { %v599_v59 = vpop.f32.mrf.mxu1 }
 0x775   :  { %604 = vrot.lane.b32.xlu1 %v599_v59, %s3217_s23 }
 0x776   :  { %v2854_v61 = vpop.f32.mrf.mxu1 }
 0x778   :  { %v776_v62 = vpop.f32.mrf.mxu1 }
 0x779   :  { %780 = vst.msk [vmem:[#allocation3 + $0x8] sm:$0xff] %vm264_vm3, %v776_v62 }
 0x77a   :  { %v2864_v63 = vpop.f32.mrf.mxu1 }
 0x77c   :  { %v946_v0 = vpop.f32.mrf.mxu1 }
 0x77d   :  { %951 = vrot.lane.b32.xlu1 %v946_v0, %s3217_s23 }
 0x77e   :  { %v2874_v1 = vpop.f32.mrf.mxu1 }
 0x7e7   :  { %v605_v2 = vpop.permute.xlu1 %604 }
 0x7e8   :  { %608 = vst.msk [vmem:[#allocation3] sm:$0xff] %vm607_vm5, %v605_v2 }
 0x7ef   :  { %v952_v3 = vpop.permute.xlu1 %951  ;;  %v955_v4 = vld [vmem:[#allocation3] sm:$0xff] }
 0x7f0   :  { %954 = vst.msk [vmem:[#allocation3 + $0x8] sm:$0xff] %vm607_vm5, %v952_v3  ;;  %2883 = vmatprep.mubr.msk.f32.mxu0 %vm118_vm0, %v955_v4 }
 0x7f7   :  { %v956_v5 = vld [vmem:[#allocation3 + $0x8] sm:$0xff] }
 0x7f8   :  { %2884 = vmatmul.mubr.msk.f32.vlgmr.msra.gmra.mxu0 %vm118_vm0, %v956_v5 }
 0x7f9   :  { %2898 = vmatpush3.msra.mxu0 %v1212_v47  ;;  %v2671_v47 = vld [vmem:[%s3759_s13] ss:$0 sm:$0xff] }
 0x7fa   :  { %2899 = vmatprep.subr.mxu0 %v1211_v48 }
 0x7fb   :  { %2900 = vmatpush3.msra.mxu0 %v1211_v48 }
 0x7fc   :  { %2901 = vmatprep.subr.mxu0 %v1210_v49 }
 0x7fd   :  { %2902 = vmatpush3.msra.mxu0 %v1210_v49 }
 0x7fe   :  { %2903 = vmatprep.subr.mxu0 %v1209_v50 }
 0x7ff   :  { %2904 = vmatpush3.msra.mxu0 %v1209_v50 }
 0x800   :  { %2905 = vmatprep.subr.mxu0 %v1208_v52 }
 0x801   :  { %2906 = vmatpush3.msra.mxu0 %v1208_v52 }
 0x802   :  { %2907 = vmatprep.subr.mxu0 %v1207_v53 }
 0x803   :  { %2908 = vmatpush3.msra.mxu0 %v1207_v53  ;;  %v2672_v53 = vld [vmem:[%s3760_s14] ss:$0 sm:$0xff] }
 0x804   :  { %2909 = vmatprep.subr.mxu0 %v1206_v41 }
 0x805   :  { %2910 = vmatpush3.msra.mxu0 %v1206_v41 }
 0x806   :  { %2911 = vmatprep.subr.mxu0 %v1205_v54 }
 0x807   :  { %2912 = vmatpush3.msra.mxu0 %v1205_v54 }
 0x808   :  { %2937 = vmatprep.subr.mxu0 %v3210_v34 }
 0x8b8   :  { %v2885_v7 = vpop.f32.mrf.mxu0 }
 0x8b9   :  { %v1046_v8 = vadd.f32 %v2885_v7, %v2660_v6 }
 0x8ba   :  { %v1040_v9 = vpop.f32.mrf.mxu0 }
 0x8bb   :  { %v1041_v10 = vadd.f32 %v2660_v6, %v1040_v9  ;;  %v1050_v11 = vadd.f32 %v1046_v8, %v3351_v33 }
 0x8bd   :  { %v1056_v12 = vsel %vm118_vm0, %v1050_v11, 0.0  ;;  %v1049_v13 = vadd.f32 %v1041_v10, %v3347_v31  ;;  %v1098_v31 = vld [vmem:[%s3753_s7 + $0x18] sm:$0xff] }
 0x8be   :  { %1057 = vadd.xlane.f32.xlu1 %v1056_v12  ;;  %2886 = vmatprep.subr.mxu1 %v1098_v31 }
 0x8bf   :  { %v1053_v14 = vsel %vm118_vm0, %v1049_v13, 0.0  ;;  %2887 = vmatpush3.msra.mxu1 %v1098_v31 }
 0x8c0   :  { %1054 = vadd.xlane.f32.xlu0 %v1053_v14  ;;  %2888 = vmatprep.subr.mxu1 %v1097_v24 }
 0x8c1   :  { %2889 = vmatpush3.msra.mxu1 %v1097_v24 }
 0x8c2   :  { %2890 = vmatprep.subr.mxu1 %v1096_v25 }
 0x8c3   :  { %2891 = vmatpush3.msra.mxu1 %v1096_v25 }
 0x8c4   :  { %2892 = vmatprep.subr.mxu1 %v1095_v26 }
 0x8c5   :  { %2893 = vmatpush3.msra.mxu1 %v1095_v26 }
 0x947   :  { %v1058_v15 = vpop.xlane.xlu1 %1057 }
 0x948   :  { %v1060_v16 = vmul.f32 0.03125, %v1058_v15  ;;  %v2668_v15 = vld [vmem:[%s3756_s10] ss:$0 sm:$0xff] }
 0x949   :  { %v1055_v17 = vpop.xlane.xlu0 %1054 }
 0x94a   :  { %v1059_v18 = vmul.f32 0.03125, %v1055_v17  ;;  %v1062_v19 = vsub.f32 %v1050_v11, %v1060_v16 }
 0x94c   :  { %v1061_v20 = vsub.f32 %v1049_v13, %v1059_v18  ;;  %v1064_v23 = vmul.f32 %v1062_v19, %v1062_v19 }
 0x94e   :  { %v1063_v21 = vmul.f32 %v1061_v20, %v1061_v20  ;;  %v1068_v33 = vsel %vm118_vm0, %v1064_v23, 0.0 }
 0x950   :  { %v1065_v22 = vsel %vm118_vm0, %v1063_v21, 0.0 }
 0x951   :  { %1066 = vadd.xlane.f32.xlu0 %v1065_v22 }
 0x955   :  { %1069 = vadd.xlane.f32.xlu0 %v1068_v33 }
 0x9da   :  { %v1067_v27 = vpop.xlane.xlu0 %1066 }
 0x9db   :  { %v1071_v28 = vmul.f32 0.03125, %v1067_v27 }
 0x9dd   :  { %v1073_v29 = vadd.f32 1e-12, %v1071_v28 }
 0x9de   :  { %v1070_v30 = vpop.xlane.xlu0 %1069 }
 0x9df   :  { %3054 = vrsqrt.f32 %v1073_v29  ;;  %v1072_v32 = vmul.f32 0.03125, %v1070_v30 }
 0x9e1   :  { %v1074_v35 = vadd.f32 1e-12, %v1072_v32 }
 0x9e3   :  { %3056 = vrsqrt.f32 %v1074_v35  ;;  %v2676_v35 = vld [vmem:[%s3774_s26 + $0x38] sm:$0xff] }
 0x9e4   :  { %2916 = vmatprep.subr.mxu1 %v2676_v35 }
 0x9ec   :  { %v3055_v36 = vpop.eup %3054 }
 0x9ed   :  { %v1077_v38 = vmul.f32 %v3055_v36, %v1061_v20  ;;  %v2675_v36 = vld [vmem:[%s3774_s26 + $0x30] sm:$0xff] }
 0x9ef   :  { %v1085_v42 = vmul.f32 %v2663_v37, %v1077_v38  ;;  %v2673_v38 = vld [vmem:[%s3774_s26 + $0x20] sm:$0xff] }
 0x9f0   :  { %v3057_v43 = vpop.eup %3056 }
 0x9f1   :  { %v1078_v40 = vmul.f32 %v3057_v43, %v1062_v19  ;;  %v3488_v44 = vadd.f32 %v2664_v39, %v1085_v42 }
 0x9f3   :  { %v1086_v45 = vmul.f32 %v2663_v37, %v1078_v40  ;;  %2894 = vmatprep.mubr.msk.f32.mxu1 %vm118_vm0, %v3488_v44  ;;  %v2674_v37 = vld [vmem:[%s3774_s26 + $0x28] sm:$0xff] }
 0x9f5   :  { %v1094_v46 = vadd.f32 %v2664_v39, %v1086_v45 }
 0x9f7   :  { %2895 = vmatmul.mubr.msk.f32.vlgmr.msra.gmra.mxu1 %vm118_vm0, %v1094_v46 }
 0x9f8   :  { %2917 = vmatpush3.msra.mxu1 %v2676_v35 }
 0x9f9   :  { %2918 = vmatprep.subr.mxu1 %v2675_v36 }
 0x9fa   :  { %2919 = vmatpush3.msra.mxu1 %v2675_v36 }
 0x9fb   :  { %2920 = vmatprep.subr.mxu1 %v2674_v37 }
 0x9fc   :  { %2921 = vmatpush3.msra.mxu1 %v2674_v37 }
 0x9fd   :  { %2922 = vmatprep.subr.mxu1 %v2673_v38 }
 0x9fe   :  { %2923 = vmatpush3.msra.mxu1 %v2673_v38 }
 0x9ff   :  { %2927 = vmatprep.subr.mxu1 %v3210_v34 }
 0xab7   :  { %v2896_v56 = vpop.f32.mrf.mxu1 }
 0xab8   :  { %v1184_v57 = vadd.f32 %v2896_v56, %v2665_v55  ;;  %v2678_v56 = vld [vmem:[%s3750_s4 + $0x1] ss:$0 sm:$0xff] }
 0xab9   :  { %v1178_v59 = vpop.f32.mrf.mxu1 }
 0xaba   :  { %v1190_v60 = vmul.f32 0.044715, %v1184_v57  ;;  %v1179_v61 = vadd.f32 %v2665_v55, %v1178_v59  ;;  %v1188_v12 = vmul.f32 0.5, %v1184_v57 }
 0xabc   :  { %v1192_v62 = vmul.f32 %v1190_v60, %v1184_v57  ;;  %v1189_v63 = vmul.f32 0.044715, %v1179_v61  ;;  %v1187_v10 = vmul.f32 0.5, %v1179_v61 }
 0xabe   :  { %v1194_v0 = vmul.f32 %v1192_v62, %v1184_v57  ;;  %v1191_v1 = vmul.f32 %v1189_v63, %v1179_v61 }
 0xac0   :  { %v1196_v2 = vadd.f32 %v1194_v0, %v1184_v57  ;;  %v1193_v3 = vmul.f32 %v1191_v1, %v1179_v61 }
 0xac2   :  { %v1198_v4 = vmul.f32 0.7978846, %v1196_v2  ;;  %v1195_v5 = vadd.f32 %v1193_v3, %v1179_v61 }
 0xac4   :  { %3058 = vtanh.f32 %v1198_v4  ;;  %v1197_v6 = vmul.f32 0.7978846, %v1195_v5 }
 0xac6   :  { %3060 = vtanh.f32 %v1197_v6 }
 0xad1   :  { %v3059_v7 = vpop.eup %3058 }
 0xad2   :  { %v1202_v9 = vadd.f32 1.0, %v3059_v7 }
 0xad3   :  { %v3061_v8 = vpop.eup %3060 }
 0xad4   :  { %v1201_v11 = vadd.f32 1.0, %v3061_v8  ;;  %v1204_v14 = vmul.f32 %v1202_v9, %v1188_v12 }
 0xad6   :  { %v1203_v13 = vmul.f32 %v1201_v11, %v1187_v10 }
 0xad8   :  { %2913 = vmatprep.mubr.msk.f32.mxu0 %vm1220_vm6, %v1203_v13 }
 0xad9   :  { %2914 = vmatmul.mubr.msk.f32.vlgmr.msra.gmra.mxu0 %vm1220_vm6, %v1204_v14 }
 0xada   :  { %2939 = vmatprep.mubr.msk.f32.mxu0 %vm3211_vm2, %v3210_v34 }
 0xb99   :  { %v2915_v16 = vpop.f32.mrf.mxu0 }
 0xb9a   :  { %v1299_v17 = vadd.f32 %v2915_v16, %v2668_v15 }
 0xb9b   :  { %v1293_v18 = vpop.f32.mrf.mxu0 }
 0xb9c   :  { %v1294_v19 = vadd.f32 %v2668_v15, %v1293_v18  ;;  %v1303_v20 = vadd.f32 %v1299_v17, %v1094_v46 }
 0xb9e   :  { %v1309_v21 = vsel %vm118_vm0, %v1303_v20, 0.0  ;;  %v1302_v22 = vadd.f32 %v1294_v19, %v3488_v44 }
 0xb9f   :  { %1310 = vadd.xlane.f32.xlu1 %v1309_v21 }
 0xba0   :  { %v1306_v23 = vsel %vm118_vm0, %v1302_v22, 0.0 }
 0xba1   :  { %1307 = vadd.xlane.f32.xlu0 %v1306_v23 }
 0xc28   :  { %v1311_v33 = vpop.xlane.xlu1 %1310 }
 0xc29   :  { %v1313_v31 = vmul.f32 0.03125, %v1311_v33 }
 0xc2a   :  { %v1308_v24 = vpop.xlane.xlu0 %1307 }
 0xc2b   :  { %v1315_v25 = vsub.f32 %v1303_v20, %v1313_v31  ;;  %v1312_v26 = vmul.f32 0.03125, %v1308_v24 }
 0xc2d   :  { %v1314_v27 = vsub.f32 %v1302_v22, %v1312_v26  ;;  %v1317_v28 = vmul.f32 %v1315_v25, %v1315_v25 }
 0xc2f   :  { %v1321_v29 = vsel %vm118_vm0, %v1317_v28, 0.0  ;;  %v1316_v30 = vmul.f32 %v1314_v27, %v1314_v27 }
 0xc30   :  { %1322 = vadd.xlane.f32.xlu1 %v1321_v29 }
 0xc31   :  { %v1318_v32 = vsel %vm118_vm0, %v1316_v30, 0.0 }
 0xc32   :  { %1319 = vadd.xlane.f32.xlu0 %v1318_v32 }
 0xcb9   :  { %v1323_v39 = vpop.xlane.xlu1 %1322 }
 0xcba   :  { %v1325_v42 = vmul.f32 0.03125, %v1323_v39 }
 0xcbb   :  { %v1320_v43 = vpop.xlane.xlu0 %1319 }
 0xcbc   :  { %v1327_v40 = vadd.f32 1e-12, %v1325_v42  ;;  %v1324_v44 = vmul.f32 0.03125, %v1320_v43 }
 0xcbe   :  { %3062 = vrsqrt.f32 %v1327_v40  ;;  %v1326_v45 = vadd.f32 1e-12, %v1324_v44 }
 0xcc0   :  { %3064 = vrsqrt.f32 %v1326_v45 }
 0xccb   :  { %v3063_v46 = vpop.eup %3062 }
 0xccc   :  { %v1331_v48 = vmul.f32 %v3063_v46, %v1315_v25 }
 0xccd   :  { %v3065_v49 = vpop.eup %3064 }
 0xcce   :  { %v1330_v50 = vmul.f32 %v3065_v49, %v1314_v27  ;;  %v1339_v52 = vmul.f32 %v2671_v47, %v1331_v48 }
 0xcd0   :  { %v1338_v41 = vmul.f32 %v2671_v47, %v1330_v50  ;;  %v3554_v55 = vadd.f32 %v2672_v53, %v1339_v52 }
 0xcd2   :  { %v3552_v54 = vadd.f32 %v2672_v53, %v1338_v41 }
 0xcd4   :  { %2924 = vmatprep.mubr.msk.f32.mxu1 %vm118_vm0, %v3552_v54 }
 0xcd5   :  { %2925 = vmatmul.mubr.msk.f32.vlgmr.msra.gmra.mxu1 %vm118_vm0, %v3554_v55 }
 0xcd6   :  { %2929 = vmatprep.mubr.msk.f32.mxu1 %vm3211_vm2, %v3210_v34 }
 0xd95   :  { %v2926_v57 = vpop.f32.mrf.mxu1 }
 0xd96   :  { %v1439_v59 = vadd.f32 %v2926_v57, %v2678_v56 }
 0xd97   :  { %v1433_v60 = vpop.f32.mrf.mxu1 }
 0xd98   :  { %1443 = vst.msk [vmem:[#allocation2 + $0x8] sm:$0xff] %vm257_vm1, %v1439_v59  ;;  %v1434_v61 = vadd.f32 %v2678_v56, %v1433_v60 }
 0xd9a   :  { %1442 = vst.msk [vmem:[#allocation2] sm:$0xff] %vm257_vm1, %v1434_v61 }
 0xd9f   :  { %v3573_v63 = vld [vmem:[#allocation2 + $0x8] sm:$0xff] }
 0xda1   :  { %v3567_v62 = vld [vmem:[#allocation2] sm:$0xff] }
 0xda2   :  { %1616 = vrot.lane.b32.xlu1 %v3567_v62, %s3213_s25  ;;  %1446 = vrot.lane.b32.xlu0 %v3567_v62, %s3212_s24 }
 0xda6   :  { %1614 = vrot.lane.b32.xlu1 %v3567_v62, %s3214_s27  ;;  %1958 = vrot.lane.b32.xlu0 %v3573_v63, %s3213_s25 }
 0xdaa   :  { %1788 = vrot.lane.b32.xlu1 %v3573_v63, %s3212_s24 }
 0xdae   :  { %1956 = vrot.lane.b32.xlu1 %v3573_v63, %s3214_s27 }
 0xe14   :  { %v1617_v0 = vpop.permute.xlu1 %1616  ;;  %v1447_v1 = vpop.permute.xlu0 %1446 }
 0xe15   :  { %2928 = vmatpush3.xpose.msk.msra.mxu1 %vm264_vm3, %v1447_v1  ;;  %2938 = vmatpush3.xpose.msk.msra.mxu0 %vm264_vm3, %v1617_v0 }
 0xe16   :  { %2947 = vmatprep.subr.mxu0 %v3210_v34  ;;  %2932 = vmatprep.subr.mxu1 %v3210_v34 }
 0xe18   :  { %v1615_v2 = vpop.permute.xlu1 %1614  ;;  %2930 = vmatmul.mubr.msk.f32.vlgmr.msra.gmra.mxu1 %vm264_vm3, %v3567_v62  ;;  %v1959_v4 = vpop.permute.xlu0 %1958 }
 0xe19   :  { %2940 = vmatmul.mubr.msk.f32.vlgmr.msra.gmra.mxu0 %vm264_vm3, %v1615_v2  ;;  %2934 = vmatprep.mubr.msk.f32.mxu1 %vm3211_vm2, %v3210_v34 }
 0xe1a   :  { %2949 = vmatprep.mubr.msk.f32.mxu0 %vm3211_vm2, %v3210_v34 }
 0xe1c   :  { %v1789_v3 = vpop.permute.xlu1 %1788 }
 0xe1d   :  { %2948 = vmatpush3.xpose.msk.msra.mxu0 %vm264_vm3, %v1789_v3 }
 0xe1e   :  { %2957 = vmatprep.subr.mxu0 %v3210_v34 }
 0xe20   :  { %2950 = vmatmul.mubr.msk.f32.vlgmr.msra.gmra.mxu0 %vm264_vm3, %v3573_v63  ;;  %v1957_v5 = vpop.permute.xlu1 %1956 }
 0xe21   :  { %2958 = vmatpush3.xpose.msk.msra.mxu0 %vm264_vm3, %v1959_v4  ;;  %2959 = vmatprep.mubr.msk.f32.mxu0 %vm3211_vm2, %v3210_v34 }
 0xe24   :  { %2960 = vmatmul.mubr.msk.f32.vlgmr.msra.gmra.mxu0 %vm264_vm3, %v1957_v5 }
 0xed8   :  { %v1518_v6 = vpop.f32.mrf.mxu1 }
 0xed9   :  { %v1522_v7 = vmul.f32 0.25, %v1518_v6  ;;  %v1688_v8 = vpop.f32.mrf.mxu0 }
 0xeda   :  { %v1692_v9 = vmul.f32 0.25, %v1688_v8  ;;  %v2931_v10 = vpop.f32.mrf.mxu1  ;;  %v2695_v8 = vld [vmem:[%s3751_s5 + $0x30] sm:$0xff] }
 0xedb   :  { %v2941_v11 = vpop.f32.mrf.mxu0  ;;  %v1523_v12 = vadd.f32 %v1522_v7, %v3393_v51  ;;  %v2696_v7 = vld [vmem:[%s3751_s5 + $0x38] sm:$0xff]  ;;  %v2693_v10 = vld [vmem:[%s3751_s5 + $0x20] sm:$0xff] }
 0xedc   :  { %v1693_v13 = vadd.f32 %v1692_v9, %v3393_v51  ;;  %2967 = vmatprep.subr.mxu0 %v2696_v7  ;;  %v2694_v9 = vld [vmem:[%s3751_s5 + $0x28] sm:$0xff] }
 0xedd   :  { %v1524_v14 = vsel %vm345_vm4, %v1523_v12, -inf  ;;  %2968 = vmatpush3.msra.mxu0 %v2696_v7 }
 0xede   :  { %1525 = vmax.xlane.f32.xlu0 %v1524_v14  ;;  %v1694_v15 = vsel %vm345_vm4, %v1693_v13, -inf  ;;  %2969 = vmatprep.subr.mxu0 %v2695_v8 }
 0xedf   :  { %1695 = vmax.xlane.f32.xlu1 %v1694_v15  ;;  %2970 = vmatpush3.msra.mxu0 %v2695_v8 }
 0xee0   :  { %v1860_v16 = vpop.f32.mrf.mxu0  ;;  %2971 = vmatprep.subr.mxu0 %v2694_v9 }
 0xee1   :  { %v1864_v17 = vmul.f32 0.25, %v1860_v16  ;;  %2972 = vmatpush3.msra.mxu0 %v2694_v9 }
 0xee2   :  { %v2951_v18 = vpop.f32.mrf.mxu0  ;;  %2973 = vmatprep.subr.mxu0 %v2693_v10 }
 0xee3   :  { %v1865_v19 = vadd.f32 %v1864_v17, %v3397_v58  ;;  %2974 = vmatpush3.msra.mxu0 %v2693_v10  ;;  %v2698_v17 = vld [vmem:[%s3752_s6 + $0x1] ss:$0 sm:$0xff] }
 0xee4   :  { %v2030_v20 = vpop.f32.mrf.mxu0 }
 0xee5   :  { %v2034_v21 = vmul.f32 0.25, %v2030_v20  ;;  %v1866_v22 = vsel %vm345_vm4, %v1865_v19, -inf }
 0xee6   :  { %1867 = vmax.xlane.f32.xlu0 %v1866_v22  ;;  %v2961_v23 = vpop.f32.mrf.mxu0 }
 0xee7   :  { %v2035_v33 = vadd.f32 %v2034_v21, %v3397_v58 }
 0xee9   :  { %v2036_v51 = vsel %vm345_vm4, %v2035_v33, -inf }
 0xeea   :  { %2037 = vmax.xlane.f32.xlu0 %v2036_v51 }
 0xf67   :  { %v1526_v31 = vpop.xlane.xlu0 %1525 }
 0xf68   :  { %v1527_v24 = vsub.f32 %v1523_v12, %v1526_v31  ;;  %v1696_v25 = vpop.xlane.xlu1 %1695 }
 0xf69   :  { %v1697_v26 = vsub.f32 %v1693_v13, %v1696_v25 }
 0xf6a   :  { %v1528_v27 = vmul.f32 1.442695, %v1527_v24 }
 0xf6b   :  { %v1698_v28 = vmul.f32 1.442695, %v1697_v26 }
 0xf6c   :  { %3066 = vpow2.f32 %v1528_v27 }
 0xf6d   :  { %3068 = vpow2.f32 %v1698_v28 }
 0xf6f   :  { %v1868_v29 = vpop.xlane.xlu0 %1867 }
 0xf70   :  { %v1869_v30 = vsub.f32 %v1865_v19, %v1868_v29 }
 0xf72   :  { %v1870_v32 = vmul.f32 1.442695, %v1869_v30 }
 0xf73   :  { %v2038_v42 = vpop.xlane.xlu0 %2037 }
 0xf74   :  { %3070 = vpow2.f32 %v1870_v32  ;;  %v2039_v43 = vsub.f32 %v2035_v33, %v2038_v42 }
 0xf76   :  { %v2040_v40 = vmul.f32 1.442695, %v2039_v43 }
 0xf78   :  { %3072 = vpow2.f32 %v2040_v40 }
 0xf79   :  { %v3067_v35 = vpop.eup %3066 }
 0xf7a   :  { %v3069_v36 = vpop.eup %3068  ;;  %v1530_v37 = vsel %vm345_vm4, %v3067_v35, 0.0 }
 0xf7b   :  { %1531 = vadd.xlane.f32.xlu0 %v1530_v37  ;;  %v1700_v58 = vsel %vm345_vm4, %v3069_v36, 0.0  ;;  %v2705_v37 = vld [vmem:[%s3753_s7 + $0x20] sm:$0xff] }
 0xf7c   :  { %1701 = vadd.xlane.f32.xlu1 %v1700_v58 }
 0xf81   :  { %v3071_v38 = vpop.eup %3070 }
 0xf82   :  { %v1872_v39 = vsel %vm345_vm4, %v3071_v38, 0.0 }
 0xf83   :  { %1873 = vadd.xlane.f32.xlu0 %v1872_v39 }
 0xf85   :  { %v3073_v44 = vpop.eup %3072 }
 0xf86   :  { %v2042_v45 = vsel %vm345_vm4, %v3073_v44, 0.0 }
 0xf8d   :  { %1705 = vrot.lane.b32.xlu1 %v3567_v62, %s3216_s15 }
 0xf91   :  { %1877 = vrot.lane.b32.xlu1 %v3573_v63, %s3215_s17 }
 0xf99   :  { %1535 = vrot.lane.b32.xlu0 %v3567_v62, %s3215_s17 }
 0xfb5   :  { %2043 = vadd.xlane.f32.xlu1 %v2042_v45  ;;  %v2703_v45 = vld [vmem:[%s3757_s11 + $0x1] ss:$0 sm:$0xff]  ;;  %s3218_s11 = smov [#allocation12]  }
 0xfb6   :  { %s2632_s24 = sshll.u32 %s3218_s11, 4  ;;  %s2633_s24 = int_to_ptr.vmem [resolvable:$true] %s2632_s24 }
 0xfb7   :  { %p3181_p7 = scmp.lt.s32.totalorder %s2633_s24, %s2633_s24 }
 0xfc6   :  { %2047 = vrot.lane.b32.xlu1 %v3573_v63, %s3216_s15 }
0x1004   :  { %v1532_v46 = vpop.xlane.xlu0 %1531 }
0x1005   :  { %3074 = vrcp.f32 %v1532_v46  ;;  %v1702_v47 = vpop.xlane.xlu1 %1701 }
0x1006   :  { %3076 = vrcp.f32 %v1702_v47  ;;  %v2704_v47 = vld [vmem:[%s3758_s12 + $0x1] ss:$0 sm:$0xff]  ;;  %s3176_s12 = scalar_lea.vmem %s2633_s24, 32 }
0x1007   :  { %p3177_p6 = scmp.ne.s32.totalorder %s2633_s24, %s3176_s12  ;;  %p3182_p8 = scmp.lt.s32.totalorder %s3176_s12, %s3176_s12 }
0x1009   :  { %v1706_v52 = vpop.permute.xlu1 %1705  ;;  %p3183_p9 = por %p3182_p8, %p3181_p7 }
0x100b   :  { %p3184_p10 = pnand %p3183_p9, %p3177_p6 }
0x100c   :  { %v1874_v48 = vpop.xlane.xlu0 %1873 }
0x100d   :  { %3078 = vrcp.f32 %v1874_v48  ;;  %v1878_v57 = vpop.permute.xlu1 %1877 }
0x1010   :  { %v1536_v49 = vpop.permute.xlu0 %1535 }
0x1011   :  { %2933 = vmatpush3.msra.mxu1 %v1536_v49 }
0x1012   :  { %v3075_v50 = vpop.eup %3074  ;;  %2942 = vmatprep.subr.mxu1 %v3210_v34 }
0x1013   :  { %v1534_v53 = vmul.f32 %v3075_v50, %v3067_v35  ;;  %v3077_v41 = vpop.eup %3076  ;;  %v2707_v35 = vld [vmem:[%s3753_s7 + $0x30] sm:$0xff] }
0x1014   :  { %v1704_v56 = vmul.f32 %v3077_v41, %v3069_v36  ;;  %v2706_v36 = vld [vmem:[%s3753_s7 + $0x28] sm:$0xff] }
0x1015   :  { %2935 = vmatmul.mubr.msk.f32.vlgmr.msra.gmra.mxu1 %vm345_vm4, %v1534_v53 }
0x1016   :  { %2943 = vmatpush3.msra.mxu1 %v1706_v52  ;;  %2944 = vmatprep.mubr.msk.f32.mxu1 %vm3211_vm2, %v3210_v34 }
0x1017   :  { %2952 = vmatprep.subr.mxu1 %v3210_v34 }
0x1019   :  { %2945 = vmatmul.mubr.msk.f32.vlgmr.msra.gmra.mxu1 %vm345_vm4, %v1704_v56  ;;  %v2720_v56 = vld [vmem:[%s3755_s9 + $0x78] sm:$0xff] }
0x101a   :  { %v3079_v59 = vpop.eup %3078  ;;  %2953 = vmatpush3.msra.mxu1 %v1878_v57  ;;  %2954 = vmatprep.mubr.msk.f32.mxu1 %vm3211_vm2, %v3210_v34  ;;  %v2719_v57 = vld [vmem:[%s3755_s9 + $0x70] sm:$0xff] }
0x101b   :  { %v1876_v60 = vmul.f32 %v3079_v59, %v3071_v38  ;;  %2962 = vmatprep.subr.mxu1 %v3210_v34  ;;  %2989 = vmatprep.subr.mxu0 %v2720_v56  ;;  %v2718_v59 = vld [vmem:[%s3755_s9 + $0x68] sm:$0xff] }
0x101d   :  { %2955 = vmatmul.mubr.msk.f32.vlgmr.msra.gmra.mxu1 %vm345_vm4, %v1876_v60  ;;  %v2717_v60 = vld [vmem:[%s3755_s9 + $0x60] sm:$0xff] }
0x101e   :  { %2964 = vmatprep.mubr.msk.f32.mxu1 %vm3211_vm2, %v3210_v34 }
0x103e   :  { %v2044_v61 = vpop.xlane.xlu1 %2043 }
0x103f   :  { %3080 = vrcp.f32 %v2044_v61  ;;  %v2716_v61 = vld [vmem:[%s3755_s9 + $0x58] sm:$0xff] }
0x1042   :  { %v2048_v62 = vpop.permute.xlu1 %2047 }
0x1043   :  { %2963 = vmatpush3.msra.mxu1 %v2048_v62  ;;  %v2715_v62 = vld [vmem:[%s3755_s9 + $0x50] sm:$0xff] }
0x104c   :  { %v3081_v63 = vpop.eup %3080 }
0x104d   :  { %v2046_v0 = vmul.f32 %v3081_v63, %v3073_v44  ;;  %v2714_v63 = vld [vmem:[%s3755_s9 + $0x48] sm:$0xff] }
0x104f   :  { %2965 = vmatmul.mubr.msk.f32.vlgmr.msra.gmra.mxu1 %vm345_vm4, %v2046_v0  ;;  %v2713_v0 = vld [vmem:[%s3755_s9 + $0x40] sm:$0xff] }
0x10d5   :  { %v1607_v1 = vpop.f32.mrf.mxu1 }
0x10d6   :  { %1611 = vst.msk [vmem:[#allocation3] sm:$0xff] %vm264_vm3, %v1607_v1  ;;  %v2710_v1 = vld [vmem:[%s3754_s8 + $0x1] ss:$0 sm:$0xff] }
0x10d7   :  { %v2936_v2 = vpop.f32.mrf.mxu1 }
0x10d9   :  { %v1777_v3 = vpop.f32.mrf.mxu1 }
0x10da   :  { %1782 = vrot.lane.b32.xlu0 %v1777_v3, %s3217_s23 }
0x10db   :  { %v2946_v4 = vpop.f32.mrf.mxu1 }
0x10dd   :  { %v1949_v5 = vpop.f32.mrf.mxu1 }
0x10de   :  { %1953 = vst.msk [vmem:[#allocation3 + $0x8] sm:$0xff] %vm264_vm3, %v1949_v5 }
0x10df   :  { %v2956_v6 = vpop.f32.mrf.mxu1 }
0x110f   :  { %v2119_v11 = vpop.f32.mrf.mxu1 }
0x1110   :  { %2124 = vrot.lane.b32.xlu1 %v2119_v11, %s3217_s23 }
0x1111   :  { %v2966_v12 = vpop.f32.mrf.mxu1 }
0x114c   :  { %v1783_v13 = vpop.permute.xlu0 %1782 }
0x114d   :  { %1785 = vst.msk [vmem:[#allocation3] sm:$0xff] %vm607_vm5, %v1783_v13 }
0x1154   :  { %v2128_v14 = vld [vmem:[#allocation3] sm:$0xff] }
0x1155   :  { %2975 = vmatprep.mubr.msk.f32.mxu0 %vm118_vm0, %v2128_v14 }
0x1182   :  { %v2125_v15 = vpop.permute.xlu1 %2124 }
0x1183   :  { %2127 = vst.msk [vmem:[#allocation3 + $0x8] sm:$0xff] %vm607_vm5, %v2125_v15 }
0x118a   :  { %v2129_v16 = vld [vmem:[#allocation3 + $0x8] sm:$0xff] }
0x118b   :  { %2976 = vmatmul.mubr.msk.f32.vlgmr.msra.gmra.mxu0 %vm118_vm0, %v2129_v16 }
0x118c   :  { %2990 = vmatpush3.msra.mxu0 %v2720_v56 }
0x118d   :  { %2991 = vmatprep.subr.mxu0 %v2719_v57 }
0x118e   :  { %2992 = vmatpush3.msra.mxu0 %v2719_v57 }
0x118f   :  { %2993 = vmatprep.subr.mxu0 %v2718_v59 }
0x1190   :  { %2994 = vmatpush3.msra.mxu0 %v2718_v59 }
0x1191   :  { %2995 = vmatprep.subr.mxu0 %v2717_v60 }
0x1192   :  { %2996 = vmatpush3.msra.mxu0 %v2717_v60 }
0x1193   :  { %2997 = vmatprep.subr.mxu0 %v2716_v61 }
0x1194   :  { %2998 = vmatpush3.msra.mxu0 %v2716_v61 }
0x1195   :  { %2999 = vmatprep.subr.mxu0 %v2715_v62 }
0x1196   :  { %3000 = vmatpush3.msra.mxu0 %v2715_v62 }
0x1197   :  { %3001 = vmatprep.subr.mxu0 %v2714_v63 }
0x1198   :  { %3002 = vmatpush3.msra.mxu0 %v2714_v63 }
0x1199   :  { %3003 = vmatprep.subr.mxu0 %v2713_v0 }
0x119a   :  { %3004 = vmatpush3.msra.mxu0 %v2713_v0 }
0x124b   :  { %v2977_v18 = vpop.f32.mrf.mxu0 }
0x124c   :  { %v2221_v19 = vadd.f32 %v2977_v18, %v2698_v17 }
0x124d   :  { %v2215_v20 = vpop.f32.mrf.mxu0 }
0x124e   :  { %v2216_v21 = vadd.f32 %v2698_v17, %v2215_v20  ;;  %v2225_v22 = vadd.f32 %v2221_v19, %v3554_v55 }
0x1250   :  { %v2233_v23 = vsel %vm118_vm0, %v2225_v22, 0.0  ;;  %v2224_v33 = vadd.f32 %v2216_v21, %v3552_v54  ;;  %v2708_v54 = vld [vmem:[%s3753_s7 + $0x38] sm:$0xff] }
0x1251   :  { %2234 = vadd.xlane.f32.xlu1 %v2233_v23  ;;  %2978 = vmatprep.subr.mxu1 %v2708_v54 }
0x1252   :  { %v2230_v51 = vsel %vm118_vm0, %v2224_v33, 0.0  ;;  %2979 = vmatpush3.msra.mxu1 %v2708_v54 }
0x1253   :  { %2231 = vadd.xlane.f32.xlu0 %v2230_v51  ;;  %2980 = vmatprep.subr.mxu1 %v2707_v35 }
0x1254   :  { %2981 = vmatpush3.msra.mxu1 %v2707_v35 }
0x1255   :  { %2982 = vmatprep.subr.mxu1 %v2706_v36 }
0x1256   :  { %2983 = vmatpush3.msra.mxu1 %v2706_v36 }
0x1257   :  { %2984 = vmatprep.subr.mxu1 %v2705_v37 }
0x1258   :  { %2985 = vmatpush3.msra.mxu1 %v2705_v37 }
0x1259   :  { %3008 = vmatprep.subr.mxu1 %v3210_v34 }
0x12da   :  { %v2235_v31 = vpop.xlane.xlu1 %2234 }
0x12db   :  { %v2237_v24 = vmul.f32 0.03125, %v2235_v31 }
0x12dc   :  { %v2232_v25 = vpop.xlane.xlu0 %2231 }
0x12dd   :  { %v2236_v26 = vmul.f32 0.03125, %v2232_v25  ;;  %v2239_v27 = vsub.f32 %v2225_v22, %v2237_v24 }
0x12df   :  { %v2238_v28 = vsub.f32 %v2224_v33, %v2236_v26  ;;  %v2241_v32 = vmul.f32 %v2239_v27, %v2239_v27  ;;  %v2722_v33 = vld [vmem:[%s3756_s10 + $0x1] ss:$0 sm:$0xff] }
0x12e1   :  { %v2240_v29 = vmul.f32 %v2238_v28, %v2238_v28  ;;  %v2245_v55 = vsel %vm118_vm0, %v2241_v32, 0.0 }
0x12e3   :  { %v2242_v30 = vsel %vm118_vm0, %v2240_v29, 0.0 }
0x12e4   :  { %2243 = vadd.xlane.f32.xlu0 %v2242_v30 }
0x12e8   :  { %2246 = vadd.xlane.f32.xlu0 %v2245_v55 }
0x136d   :  { %v2244_v58 = vpop.xlane.xlu0 %2243 }
0x136e   :  { %v2248_v38 = vmul.f32 0.03125, %v2244_v58 }
0x1370   :  { %v2250_v39 = vadd.f32 1e-12, %v2248_v38 }
0x1371   :  { %v2247_v42 = vpop.xlane.xlu0 %2246 }
0x1372   :  { %3082 = vrsqrt.f32 %v2250_v39  ;;  %v2249_v43 = vmul.f32 0.03125, %v2247_v42  ;;  %v2538_v42 = vld [vmem:[#allocation10 + $0x18] sm:$0xff] }
0x1374   :  { %v2251_v40 = vadd.f32 1e-12, %v2249_v43  ;;  %v2537_v43 = vld [vmem:[#allocation10 + $0x10] sm:$0xff] }
0x1376   :  { %3084 = vrsqrt.f32 %v2251_v40  ;;  %v2536_v40 = vld [vmem:[#allocation10 + $0x8] sm:$0xff] }
0x137f   :  { %v3083_v44 = vpop.eup %3082 }
0x1380   :  { %v2254_v46 = vmul.f32 %v3083_v44, %v2238_v28  ;;  %v2535_v44 = vld [vmem:[#allocation10] sm:$0xff] }
0x1382   :  { %v2262_v48 = vmul.f32 %v2703_v45, %v2254_v46 }
0x1383   :  { %v3085_v49 = vpop.eup %3084 }
0x1384   :  { %v2255_v50 = vmul.f32 %v3085_v49, %v2239_v27  ;;  %v3683_v52 = vadd.f32 %v2704_v47, %v2262_v48 }
0x1386   :  { %v2263_v53 = vmul.f32 %v2703_v45, %v2255_v50  ;;  %2986 = vmatprep.mubr.msk.f32.mxu1 %vm118_vm0, %v3683_v52 }
0x1388   :  { %v2271_v41 = vadd.f32 %v2704_v47, %v2263_v53  ;;  %v2727_v53 = vld [vmem:[%s3759_s13 + $0x1] ss:$0 sm:$0xff] }
0x138a   :  { %2987 = vmatmul.mubr.msk.f32.vlgmr.msra.gmra.mxu1 %vm118_vm0, %v2271_v41 }
0x138b   :  { %3016 = vmatprep.mubr.msk.f32.mxu1 %vm3211_vm2, %v3210_v34  ;;  %3009 = vmatpush3.msra.mxu1 %v2538_v42 }
0x138c   :  { %3010 = vmatprep.subr.mxu1 %v3210_v34 }
0x138d   :  { %3011 = vmatpush3.msra.mxu1 %v2537_v43 }
0x138e   :  { %3012 = vmatprep.subr.mxu1 %v3210_v34 }
0x138f   :  { %3013 = vmatpush3.msra.mxu1 %v2536_v40 }
0x1390   :  { %3014 = vmatprep.subr.mxu1 %v3210_v34  ;;  %v2728_v34 = vld [vmem:[%s3760_s14 + $0x1] ss:$0 sm:$0xff] }
0x1391   :  { %3015 = vmatpush3.msra.mxu1 %v2535_v44 }
0x144a   :  { %v2988_v2 = vpop.f32.mrf.mxu1 }
0x144b   :  { %v2363_v3 = vadd.f32 %v2988_v2, %v2710_v1 }
0x144c   :  { %v2357_v4 = vpop.f32.mrf.mxu1 }
0x144d   :  { %v2369_v5 = vmul.f32 0.044715, %v2363_v3  ;;  %v2358_v6 = vadd.f32 %v2710_v1, %v2357_v4  ;;  %v2367_v21 = vmul.f32 0.5, %v2363_v3  ;;  %v2729_v1 = vld [vmem:[%s3762_s16] ss:$0 sm:$0xff] }
0x144f   :  { %v2371_v7 = vmul.f32 %v2369_v5, %v2363_v3  ;;  %v2368_v8 = vmul.f32 0.044715, %v2358_v6  ;;  %v2366_v19 = vmul.f32 0.5, %v2358_v6  ;;  %v2620_v5 = vld [vmem:[%s3764_s18] sm:$0x3] }
0x1450   :  { %vm2621_vm8 = vcmp.lt.f32.partialorder %v2620_v5, 0.7 }
0x1451   :  { %v2373_v9 = vmul.f32 %v2371_v7, %v2363_v3  ;;  %v2370_v10 = vmul.f32 %v2368_v8, %v2358_v6 }
0x1453   :  { %v2375_v11 = vadd.f32 %v2373_v9, %v2363_v3  ;;  %v2372_v12 = vmul.f32 %v2370_v10, %v2358_v6 }
0x1455   :  { %v2377_v13 = vmul.f32 0.7978846, %v2375_v11  ;;  %v2374_v14 = vadd.f32 %v2372_v12, %v2358_v6 }
0x1457   :  { %3086 = vtanh.f32 %v2377_v13  ;;  %v2376_v15 = vmul.f32 0.7978846, %v2374_v14 }
0x1459   :  { %3088 = vtanh.f32 %v2376_v15 }
0x1464   :  { %v3087_v16 = vpop.eup %3086 }
0x1465   :  { %v2381_v18 = vadd.f32 1.0, %v3087_v16 }
0x1466   :  { %v3089_v17 = vpop.eup %3088 }
0x1467   :  { %v2380_v20 = vadd.f32 1.0, %v3089_v17  ;;  %v2383_v23 = vmul.f32 %v2381_v18, %v2367_v21 }
0x1469   :  { %v2382_v22 = vmul.f32 %v2380_v20, %v2366_v19 }
0x146b   :  { %3005 = vmatprep.mubr.msk.f32.mxu0 %vm1220_vm6, %v2382_v22 }
0x146c   :  { %3006 = vmatmul.mubr.msk.f32.vlgmr.msra.gmra.mxu0 %vm1220_vm6, %v2383_v23 }
0x152c   :  { %v3007_v51 = vpop.f32.mrf.mxu0 }
0x152d   :  { %v2479_v31 = vadd.f32 %v3007_v51, %v2722_v33 }
0x152e   :  { %v2473_v24 = vpop.f32.mrf.mxu0 }
0x152f   :  { %v2474_v25 = vadd.f32 %v2722_v33, %v2473_v24  ;;  %v2483_v26 = vadd.f32 %v2479_v31, %v2271_v41 }
0x1531   :  { %v2491_v27 = vsel %vm118_vm0, %v2483_v26, 0.0  ;;  %v2482_v28 = vadd.f32 %v2474_v25, %v3683_v52 }
0x1532   :  { %2492 = vadd.xlane.f32.xlu0 %v2491_v27 }
0x1533   :  { %v2488_v29 = vsel %vm118_vm0, %v2482_v28, 0.0 }
0x1534   :  { %2489 = vadd.xlane.f32.xlu1 %v2488_v29 }
0x15bb   :  { %v2493_v30 = vpop.xlane.xlu0 %2492 }
0x15bc   :  { %v2495_v32 = vmul.f32 0.03125, %v2493_v30 }
0x15bd   :  { %v2490_v55 = vpop.xlane.xlu1 %2489 }
0x15be   :  { %v2497_v54 = vsub.f32 %v2483_v26, %v2495_v32  ;;  %v2494_v35 = vmul.f32 0.03125, %v2490_v55 }
0x15c0   :  { %v2496_v36 = vsub.f32 %v2482_v28, %v2494_v35  ;;  %v2499_v37 = vmul.f32 %v2497_v54, %v2497_v54 }
0x15c2   :  { %v2503_v58 = vsel %vm118_vm0, %v2499_v37, 0.0  ;;  %v2498_v38 = vmul.f32 %v2496_v36, %v2496_v36 }
0x15c3   :  { %2504 = vadd.xlane.f32.xlu0 %v2503_v58 }
0x15c4   :  { %v2500_v39 = vsel %vm118_vm0, %v2498_v38, 0.0 }
0x15c5   :  { %2501 = vadd.xlane.f32.xlu1 %v2500_v39 }
0x164c   :  { %v2505_v45 = vpop.xlane.xlu0 %2504 }
0x164d   :  { %v2507_v46 = vmul.f32 0.03125, %v2505_v45 }
0x164e   :  { %v2502_v47 = vpop.xlane.xlu1 %2501 }
0x164f   :  { %v2509_v48 = vadd.f32 1e-12, %v2507_v46  ;;  %v2506_v49 = vmul.f32 0.03125, %v2502_v47 }
0x1651   :  { %3090 = vrsqrt.f32 %v2509_v48  ;;  %v2508_v50 = vadd.f32 1e-12, %v2506_v49 }
0x1653   :  { %3092 = vrsqrt.f32 %v2508_v50 }
0x165e   :  { %v3091_v52 = vpop.eup %3090 }
0x165f   :  { %v2513_v41 = vmul.f32 %v3091_v52, %v2497_v54 }
0x1660   :  { %v3093_v56 = vpop.eup %3092 }
0x1661   :  { %v2512_v57 = vmul.f32 %v3093_v56, %v2496_v36  ;;  %v2521_v59 = vmul.f32 %v2727_v53, %v2513_v41 }
0x1663   :  { %v2520_v60 = vmul.f32 %v2727_v53, %v2512_v57  ;;  %v2529_v61 = vadd.f32 %v2728_v34, %v2521_v59 }
0x1665   :  { %v2528_v62 = vadd.f32 %v2728_v34, %v2520_v60  ;;  %v2531_v63 = vrot.slane %v2529_v61, 7 }
0x1667   :  { %v2534_v0 = vsel %vm2533_vm7, %v2528_v62, %v2531_v63 }
0x1668   :  { %3017 = vmatmul.mubr.msk.f32.vlgmr.msra.gmra.mxu1 %vm118_vm0, %v2534_v0 }
0x1728   :  { %v2615_v2 = vpop.f32.mrf.mxu1 }
0x1729   :  { %v2616_v3 = vadd.f32 %v2729_v1, %v2615_v2 }
0x172a   :  { %v3018_v4 = vpop.f32.mrf.mxu1 }
0x172b   :  { %3094 = vtanh.f32 %v2616_v3 }
0x1738   :  { %v3095_v6 = vpop.eup %3094 }
0x1739   :  { %v2622_v7 = vmul.f32 1.4285715, %v3095_v6 }
0x173b   :  { %v2623_v8 = vsel %vm2621_vm8, %v2622_v7, 0.0 }
0x173c   :  { %2625 = vst.msk [vmem:[#allocation12] sm:$0x3] %vm2624_vm9, %v2623_v8 }
0x173d   :  { %3187 = shalt.err (!%p3184_p10)
}
0x173e   :  { %2635 = dma.vmem_to_hbm [thread:$0]  %s2633_s24, 32, %s3765_s19, [#allocation6]  }
0x173f   :  { %3202 = dma.done.wait [#allocation6], 32  }
0x1740   :  { %3203 = vsyncadd [#allocation6], 4294967264 }
0x1741   :  { %2639 = vsyncpa [#allocation5], 1 }
0x1742   :  { %2640 = vsyncpa [#allocation8], 1 }
0x1743   :  { %2641 = vsyncpa [#allocation11], 1 }
0x1744   :  { %2642 = vsyncpa [#allocation6], 1 }

</bundles_post_ra>
